<compile_context>
chip_gen: v6e
topology: v6e:2x2x1
jax: 0.10.0
libtpu: 0.0.40
codegen_flags: <defaults>
</compile_context>

<pallas_src>
import jax
import jax.numpy as jnp
import numpy as np
from jax.experimental import pallas as pl
from jax.experimental.pallas import tpu as pltpu


# ----------------------------------------------------------------------------- kernel
def _resblock_kernel(xcat_ref, w1_ref, s1_ref, c1_ref,
                     w2_ref, s2_ref, c2_ref, ssk_ref, csk_ref,
                     out_ref, h1p_ref):
    # xcat_ref : (Nb*H, 3*W*Cin)     f32  kh-unfolded, lane-dense input rows (Nb images)
    # w1_ref   : (3*W*Cin, 2*W*Cout) bf16 [banded conv1 | block-diag 1x1 skip on kh=1 rows]
    # w2_ref   : (3*W*Cout, W*Cout)  bf16 banded conv2, kh stacked into K
    # s*/c*    : (1, W*Cout)         f32  folded BatchNorm scale / bias (tiled over W)
    # out_ref  : (Nb*H, W*Cout)      f32  lane-dense output rows
    # h1p_ref  : (Nb, H+2, W*Cout)   f32  VMEM scratch: per-image H-padded intermediate
    M, WCo = out_ref.shape
    Nb, Hp, _ = h1p_ref.shape
    H = Hp - 2

    # ---- conv1 (3x3, kh folded into K) fused with the 1x1 skip: one bf16 MXU dot ----
    y1 = jnp.dot(xcat_ref[...].astype(jnp.bfloat16), w1_ref[...],
                 preferred_element_type=jnp.float32)                 # (M, 2*WCo) f32
    h1 = jnp.maximum(y1[:, :WCo] * s1_ref[...] + c1_ref[...], 0.0)   # BN1 + ReLU
    skip = y1[:, WCo:] * ssk_ref[...] + csk_ref[...]                 # skip BN (no ReLU)

    # ---- stash h1 in the per-image H-padded scratch; zero only the border rows ------
    # (re-zeroed every step so per-core scratch stays correct under megacore splits)
    h1p_ref[:, 0:1, :] = jnp.zeros((Nb, 1, WCo), jnp.float32)
    h1p_ref[:, Hp - 1:Hp, :] = jnp.zeros((Nb, 1, WCo), jnp.float32)
    h1p_ref[:, 1:H + 1, :] = h1.reshape(Nb, H, WCo)

    # ---- conv2 (3x3): lane-aligned concat of the 3 row-shifted views -> one dot -----
    h1cat = jnp.concatenate([h1p_ref[:, kh:kh + H, :] for kh in range(3)], axis=-1)
    h1cat = h1cat.reshape(M, 3 * WCo).astype(jnp.bfloat16)           # (M, 3*WCo)
    h2 = jnp.maximum(
        jnp.dot(h1cat, w2_ref[...], preferred_element_type=jnp.float32)
        * s2_ref[...] + c2_ref[...], 0.0)                            # BN2 + ReLU

    # ---- residual add + final ReLU: single unmasked lane-dense store ----------------
    out_ref[...] = jnp.maximum(h2 + skip, 0.0)


# ---------------------------------------------------------------------------- helpers
def _banded_conv3x3(w_oihw, W):
    """Fold the kw taps + W dim of a 3x3/pad=1/stride=1 conv into per-kh matmul weights.

    Returns B of shape (3, W*Cin, W*Cout) with
        B[kh][wi*Cin + c, wo*Cout + o] = w[o, c, kh, kw]   where wi = wo + kw - 1,
    so that   out[h, wo*Cout + o] = sum_kh  xrow_padH[h + kh, :] @ B[kh].
    Out-of-range wi are simply absent from the band (== zero padding along W);
    zero rows of the H-padded input supply the kh border.
    """
    KH, KW = w_oihw.shape[2], w_oihw.shape[3]
    w = jnp.transpose(w_oihw, (2, 3, 1, 0)).astype(jnp.float32)      # (kh, kw, Cin, Cout)
    Cin, Cout = w.shape[2], w.shape[3]
    wi = jnp.arange(W)[:, None]
    wo = jnp.arange(W)[None, :]
    bands = []
    for kh in range(KH):
        acc = jnp.zeros((W, Cin, W, Cout), jnp.float32)
        for kw in range(KW):
            sel = (wi == wo + (kw - 1)).astype(jnp.float32)          # (W, W) 0/1 band
            acc = acc + sel[:, None, :, None] * w[kh, kw][None, :, None, :]
        bands.append(acc.reshape(W * Cin, W * Cout))
    return jnp.stack(bands, axis=0)


def _pick_images_per_step(N, H):
    """Fold Nb images into the matmul M dim: target M in [128, 256]; keep >=2 grid
    steps (v7x megacore) only when that still yields M >= 128."""
    divisors = [d for d in range(1, N + 1) if N % d == 0]
    cands = [d for d in divisors if d * H <= 256] or [1]
    nb = max(cands)
    if N // nb < 2:
        keep_two = [d for d in cands if N // d >= 2 and d * H >= 128]
        if keep_two:
            nb = max(keep_two)
    return nb


# ---------------------------------------------------------------------------- wrapper
def residual_block_pallas(x_nchw, params, eps=1e-5, *, single_buffer_consts=True):
    """x_nchw: (N, Cin, H, W) float32 -> (N, Cout, H, W) float32 (inference-mode BN)."""
    x = jnp.transpose(x_nchw, (0, 2, 3, 1)).astype(jnp.float32)      # NHWC
    N, H, W, Cin = x.shape
    Cout = params["w1"].shape[0]
    WCi, WCo = W * Cin, W * Cout
    Hp = H + 2

    nb = _pick_images_per_step(N, H)          # images folded into M per grid step

    # lane-dense rows, H-padded, kh-unfolded along the lane (K) axis:
    #   xcat[n*H + h, kh*WCi + wc] = xpad[n, h + kh, wc]
    xpad = jnp.pad(x.reshape(N, H, WCi), ((0, 0), (1, 1), (0, 0)))   # (N, Hp, W*Cin)
    xcat = jnp.concatenate([xpad[:, kh:kh + H, :] for kh in range(3)], axis=-1)
    xcat = xcat.reshape(N * H, 3 * WCi)

    # banded / block-diagonal matmul weights (tiny, built once), kh stacked into K,
    # skip fused onto conv1's output axis; bf16 for the MXU.
    b1 = _banded_conv3x3(params["w1"], W).reshape(3 * WCi, WCo)      # (3*WCi, WCo) f32
    b2 = _banded_conv3x3(params["w2"], W).reshape(3 * WCo, WCo).astype(jnp.bfloat16)
    wsk_io = jnp.transpose(params["wsk"][:, :, 0, 0], (1, 0)).astype(jnp.float32)
    eye = (jnp.arange(W)[:, None] == jnp.arange(W)[None, :]).astype(jnp.float32)
    bsk = (eye[:, None, :, None] * wsk_io[None, :, None, :]).reshape(WCi, WCo)
    skip_col = jnp.concatenate(
        [jnp.zeros((WCi, WCo), jnp.float32), bsk, jnp.zeros((WCi, WCo), jnp.float32)],
        axis=0)                                                       # skip lives on kh=1 rows
    w1_big = jnp.concatenate([b1, skip_col], axis=1).astype(jnp.bfloat16)  # (3*WCi, 2*WCo)

    def fold_bn(g, b, m, v):
        s = g / jnp.sqrt(v + eps)
        c = b - m * s
        # tile per-channel params across W so they line up with the (w*Cout + o) lane axis
        return jnp.tile(s, W).reshape(1, WCo), jnp.tile(c, W).reshape(1, WCo)

    s1, c1 = fold_bn(params["g1"], params["be1"], params["m1"], params["v1"])
    s2, c2 = fold_bn(params["g2"], params["be2"], params["m2"], params["v2"])
    ssk, csk = fold_bn(params["gsk"], params["besk"], params["msk"], params["vsk"])

    def const(shape):
        idx = lambda n: (0,) * len(shape)
        if single_buffer_consts:
            # constant index_map -> single-buffer to halve its VMEM footprint
            return pl.BlockSpec(shape, idx, pipeline_mode=pl.Buffered(1))
        return pl.BlockSpec(shape, idx)

    out2d = pl.pallas_call(
        _resblock_kernel,
        out_shape=jax.ShapeDtypeStruct((N * H, WCo), jnp.float32),
        grid_spec=pltpu.PrefetchScalarGridSpec(
            num_scalar_prefetch=0,
            grid=(N // nb,),
            in_specs=[
                pl.BlockSpec((nb * H, 3 * WCi), lambda n: (n, 0)),
                const((3 * WCi, 2 * WCo)), const((1, WCo)), const((1, WCo)),
                const((3 * WCo, WCo)), const((1, WCo)), const((1, WCo)),
                const((1, WCo)), const((1, WCo)),
            ],
            out_specs=pl.BlockSpec((nb * H, WCo), lambda n: (n, 0)),
            scratch_shapes=[pltpu.VMEM((nb, Hp, WCo), jnp.float32)],
        ),
        compiler_params=pltpu.CompilerParams(
            dimension_semantics=("parallel",),            # batch slabs across TCs (v7x)
            vmem_limit_bytes=32 * 1024 * 1024,            # above v5e's 16 MiB scoped default
        ),
    )(xcat, w1_big, s1, c1, b2, s2, c2, ssk, csk)

    out = out2d.reshape(N, H, W, Cout)
    return jnp.transpose(out, (0, 3, 1, 2))               # back to NCHW


# -------------------------------------------------------------------------- reference
def _reference(x_nchw, params, eps=1e-5):
    """Pure-JAX reference mirroring the kernel numerics (bf16 matmul inputs, f32 accum/BN)."""
    x = jnp.transpose(x_nchw, (0, 2, 3, 1)).astype(jnp.float32)

    def conv(h, w_oihw, pad):
        w = jnp.transpose(w_oihw, (2, 3, 1, 0))
        return jax.lax.conv_general_dilated(
            h.astype(jnp.bfloat16), w.astype(jnp.bfloat16), (1, 1),
            [(pad, pad), (pad, pad)],
            dimension_numbers=("NHWC", "HWIO", "NHWC"),
            preferred_element_type=jnp.float32)

    def bn(y, g, b, m, v):
        s = g / jnp.sqrt(v + eps)
        return y * s + (b - m * s)

    h = jax.nn.relu(bn(conv(x, params["w1"], 1),
                       params["g1"], params["be1"], params["m1"], params["v1"]))
    h = jax.nn.relu(bn(conv(h, params["w2"], 1),
                       params["g2"], params["be2"], params["m2"], params["v2"]))
    sk = bn(conv(x, params["wsk"], 0),
            params["gsk"], params["besk"], params["msk"], params["vsk"])
    out = jax.nn.relu(h + sk)
    return jnp.transpose(out, (0, 3, 1, 2))


# -------------------------------------------------------------------------------- main
if __name__ == "__main__":
    N, Cin, Cout, H, W = 2, 4, 8, 16, 16   # in_channels != out_channels -> skip path active
    key = jax.random.PRNGKey(0)
    ks = jax.random.split(key, 16)

    params = {
        # conv weights (PyTorch OIHW)
        "w1": jax.random.normal(ks[0], (Cout, Cin, 3, 3), jnp.float32) * 0.1,
        "w2": jax.random.normal(ks[1], (Cout, Cout, 3, 3), jnp.float32) * 0.1,
        "wsk": jax.random.normal(ks[2], (Cout, Cin, 1, 1), jnp.float32) * 0.1,
        # BatchNorm params (gamma, beta, running_mean, running_var)
        "g1": jax.random.uniform(ks[3], (Cout,), jnp.float32, 0.5, 1.5),
        "be1": jax.random.normal(ks[4], (Cout,), jnp.float32) * 0.1,
        "m1": jax.random.normal(ks[5], (Cout,), jnp.float32) * 0.1,
        "v1": jax.random.uniform(ks[6], (Cout,), jnp.float32, 0.5, 1.5),
        "g2": jax.random.uniform(ks[7], (Cout,), jnp.float32, 0.5, 1.5),
        "be2": jax.random.normal(ks[8], (Cout,), jnp.float32) * 0.1,
        "m2": jax.random.normal(ks[9], (Cout,), jnp.float32) * 0.1,
        "v2": jax.random.uniform(ks[10], (Cout,), jnp.float32, 0.5, 1.5),
        "gsk": jax.random.uniform(ks[11], (Cout,), jnp.float32, 0.5, 1.5),
        "besk": jax.random.normal(ks[12], (Cout,), jnp.float32) * 0.1,
        "msk": jax.random.normal(ks[13], (Cout,), jnp.float32) * 0.1,
        "vsk": jax.random.uniform(ks[14], (Cout,), jnp.float32, 0.5, 1.5),
    }

    x = jax.random.normal(ks[15], (N, Cin, H, W), jnp.float32)

    run = jax.jit(residual_block_pallas, static_argnames=("single_buffer_consts",))
    try:
        out = jax.block_until_ready(run(x, params, single_buffer_consts=True))
    except Exception:
        # Fallback for jax builds without per-BlockSpec pipeline_mode support.
        out = jax.block_until_ready(run(x, params, single_buffer_consts=False))
    ref = jax.block_until_ready(_reference(x, params))

    np.testing.assert_allclose(np.asarray(out), np.asarray(ref), rtol=1e-2, atol=1e-2)
    print("KERNEL_OK")
</pallas_src>

<mosaic_0001>
module attributes {stable_mosaic.version = 11 : i64} {
  func.func @_resblock_kernel(%arg0: i32, %arg1: memref<32x192xf32, #tpu.memory_space<vmem>>, %arg2: memref<192x256xbf16, #tpu.memory_space<vmem>>, %arg3: memref<1x128xf32, #tpu.memory_space<vmem>>, %arg4: memref<1x128xf32, #tpu.memory_space<vmem>>, %arg5: memref<384x128xbf16, #tpu.memory_space<vmem>>, %arg6: memref<1x128xf32, #tpu.memory_space<vmem>>, %arg7: memref<1x128xf32, #tpu.memory_space<vmem>>, %arg8: memref<1x128xf32, #tpu.memory_space<vmem>>, %arg9: memref<1x128xf32, #tpu.memory_space<vmem>>, %arg10: memref<32x128xf32, #tpu.memory_space<vmem>>, %arg11: memref<2x18x128xf32, #tpu.memory_space<vmem>>) attributes {dimension_semantics = [#tpu.dimension_semantics<parallel>], iteration_bounds = array<i64: 1>, scalar_prefetch = 0 : i64, scratch_operands = 1 : i64, tpu.core_type = #tpu.core_type<tc>, window_params = [{transform_indices = @transform_0, window_bounds = array<i64: 32, 192>}, {pipeline_mode = #tpu.pipeline_mode<synchronous>, transform_indices = @transform_1, window_bounds = array<i64: 192, 256>}, {pipeline_mode = #tpu.pipeline_mode<synchronous>, transform_indices = @transform_2, window_bounds = array<i64: 1, 128>}, {pipeline_mode = #tpu.pipeline_mode<synchronous>, transform_indices = @transform_3, window_bounds = array<i64: 1, 128>}, {pipeline_mode = #tpu.pipeline_mode<synchronous>, transform_indices = @transform_4, window_bounds = array<i64: 384, 128>}, {pipeline_mode = #tpu.pipeline_mode<synchronous>, transform_indices = @transform_5, window_bounds = array<i64: 1, 128>}, {pipeline_mode = #tpu.pipeline_mode<synchronous>, transform_indices = @transform_6, window_bounds = array<i64: 1, 128>}, {pipeline_mode = #tpu.pipeline_mode<synchronous>, transform_indices = @transform_7, window_bounds = array<i64: 1, 128>}, {pipeline_mode = #tpu.pipeline_mode<synchronous>, transform_indices = @transform_8, window_bounds = array<i64: 1, 128>}, {transform_indices = @transform_9, window_bounds = array<i64: 32, 128>}]} {
    %c0 = arith.constant 0 : index
    %c0_0 = arith.constant 0 : index
    %0 = vector.load %arg1[%c0, %c0_0] : memref<32x192xf32, #tpu.memory_space<vmem>>, vector<32x192xf32>
    %1 = arith.truncf %0 : vector<32x192xf32> to vector<32x192xbf16>
    %c0_1 = arith.constant 0 : index
    %c0_2 = arith.constant 0 : index
    %2 = vector.load %arg2[%c0_1, %c0_2] : memref<192x256xbf16, #tpu.memory_space<vmem>>, vector<192x256xbf16>
    %cst = arith.constant dense<0.000000e+00> : vector<32x256xf32>
    %3 = tpu.matmul %1, %2, %cst {dimension_numbers = #tpu.dot_dimension_numbers<[1], [0], [0], [1], [0, 0, 1, 1], [], []>} : vector<32x192xbf16>, vector<192x256xbf16>, vector<32x256xf32> -> vector<32x256xf32>
    %4 = vector.extract_strided_slice %3 {offsets = [0, 0], sizes = [32, 128], strides = [1, 1]} : vector<32x256xf32> to vector<32x128xf32>
    %c0_3 = arith.constant 0 : index
    %c0_4 = arith.constant 0 : index
    %5 = vector.load %arg3[%c0_3, %c0_4] : memref<1x128xf32, #tpu.memory_space<vmem>>, vector<1x128xf32>
    %6 = vector.broadcast %5 : vector<1x128xf32> to vector<32x128xf32>
    %7 = arith.mulf %4, %6 : vector<32x128xf32>
    %c0_5 = arith.constant 0 : index
    %c0_6 = arith.constant 0 : index
    %8 = vector.load %arg4[%c0_5, %c0_6] : memref<1x128xf32, #tpu.memory_space<vmem>>, vector<1x128xf32>
    %9 = vector.broadcast %8 : vector<1x128xf32> to vector<32x128xf32>
    %10 = arith.addf %7, %9 : vector<32x128xf32>
    %cst_7 = arith.constant 0.000000e+00 : f32
    %11 = vector.broadcast %cst_7 : f32 to vector<32x128xf32>
    %12 = arith.maximumf %10, %11 : vector<32x128xf32>
    %13 = vector.extract_strided_slice %3 {offsets = [0, 128], sizes = [32, 128], strides = [1, 1]} : vector<32x256xf32> to vector<32x128xf32>
    %c0_8 = arith.constant 0 : index
    %c0_9 = arith.constant 0 : index
    %14 = vector.load %arg8[%c0_8, %c0_9] : memref<1x128xf32, #tpu.memory_space<vmem>>, vector<1x128xf32>
    %15 = vector.broadcast %14 : vector<1x128xf32> to vector<32x128xf32>
    %16 = arith.mulf %13, %15 : vector<32x128xf32>
    %c0_10 = arith.constant 0 : index
    %c0_11 = arith.constant 0 : index
    %17 = vector.load %arg9[%c0_10, %c0_11] : memref<1x128xf32, #tpu.memory_space<vmem>>, vector<1x128xf32>
    %18 = vector.broadcast %17 : vector<1x128xf32> to vector<32x128xf32>
    %19 = arith.addf %16, %18 : vector<32x128xf32>
    %cst_12 = arith.constant 0.000000e+00 : f32
    %20 = vector.broadcast %cst_12 : f32 to vector<2x1x128xf32>
    %c0_13 = arith.constant 0 : index
    %c0_14 = arith.constant 0 : index
    %c0_15 = arith.constant 0 : index
    %21 = vector.load %arg11[%c0_13, %c0_14, %c0_15] : memref<2x18x128xf32, #tpu.memory_space<vmem>>, vector<2x1x128xf32>
    tpu.vector_store %arg11[%c0_13, %c0_14, %c0_15], %20 {strides = array<i32>} : memref<2x18x128xf32, #tpu.memory_space<vmem>>, vector<2x1x128xf32>,
    %cst_16 = arith.constant 0.000000e+00 : f32
    %22 = vector.broadcast %cst_16 : f32 to vector<2x1x128xf32>
    %c0_17 = arith.constant 0 : index
    %c17 = arith.constant 17 : index
    %c0_18 = arith.constant 0 : index
    %23 = vector.load %arg11[%c0_17, %c17, %c0_18] : memref<2x18x128xf32, #tpu.memory_space<vmem>>, vector<2x1x128xf32>
    tpu.vector_store %arg11[%c0_17, %c17, %c0_18], %22 {strides = array<i32>} : memref<2x18x128xf32, #tpu.memory_space<vmem>>, vector<2x1x128xf32>,
    %24 = vector.shape_cast %12 : vector<32x128xf32> to vector<2x16x128xf32>
    %c0_19 = arith.constant 0 : index
    %c1 = arith.constant 1 : index
    %c0_20 = arith.constant 0 : index
    %25 = vector.load %arg11[%c0_19, %c1, %c0_20] : memref<2x18x128xf32, #tpu.memory_space<vmem>>, vector<2x16x128xf32>
    tpu.vector_store %arg11[%c0_19, %c1, %c0_20], %24 {strides = array<i32>} : memref<2x18x128xf32, #tpu.memory_space<vmem>>, vector<2x16x128xf32>,
    %c0_21 = arith.constant 0 : index
    %c0_22 = arith.constant 0 : index
    %c0_23 = arith.constant 0 : index
    %26 = vector.load %arg11[%c0_21, %c0_22, %c0_23] : memref<2x18x128xf32, #tpu.memory_space<vmem>>, vector<2x16x128xf32>
    %c0_24 = arith.constant 0 : index
    %c1_25 = arith.constant 1 : index
    %c0_26 = arith.constant 0 : index
    %27 = vector.load %arg11[%c0_24, %c1_25, %c0_26] : memref<2x18x128xf32, #tpu.memory_space<vmem>>, vector<2x16x128xf32>
    %c0_27 = arith.constant 0 : index
    %c2 = arith.constant 2 : index
    %c0_28 = arith.constant 0 : index
    %28 = vector.load %arg11[%c0_27, %c2, %c0_28] : memref<2x18x128xf32, #tpu.memory_space<vmem>>, vector<2x16x128xf32>
    %29 = tpu.concatenate %26, %27, %28 in 2 : vector<2x16x128xf32>, vector<2x16x128xf32>, vector<2x16x128xf32> -> vector<2x16x384xf32>
    %30 = vector.shape_cast %29 : vector<2x16x384xf32> to vector<32x384xf32>
    %31 = arith.truncf %30 : vector<32x384xf32> to vector<32x384xbf16>
    %c0_29 = arith.constant 0 : index
    %c0_30 = arith.constant 0 : index
    %32 = vector.load %arg5[%c0_29, %c0_30] : memref<384x128xbf16, #tpu.memory_space<vmem>>, vector<384x128xbf16>
    %cst_31 = arith.constant dense<0.000000e+00> : vector<32x128xf32>
    %33 = tpu.matmul %31, %32, %cst_31 {dimension_numbers = #tpu.dot_dimension_numbers<[1], [0], [0], [1], [0, 0, 1, 1], [], []>} : vector<32x384xbf16>, vector<384x128xbf16>, vector<32x128xf32> -> vector<32x128xf32>
    %c0_32 = arith.constant 0 : index
    %c0_33 = arith.constant 0 : index
    %34 = vector.load %arg6[%c0_32, %c0_33] : memref<1x128xf32, #tpu.memory_space<vmem>>, vector<1x128xf32>
    %35 = vector.broadcast %34 : vector<1x128xf32> to vector<32x128xf32>
    %36 = arith.mulf %33, %35 : vector<32x128xf32>
    %c0_34 = arith.constant 0 : index
    %c0_35 = arith.constant 0 : index
    %37 = vector.load %arg7[%c0_34, %c0_35] : memref<1x128xf32, #tpu.memory_space<vmem>>, vector<1x128xf32>
    %38 = vector.broadcast %37 : vector<1x128xf32> to vector<32x128xf32>
    %39 = arith.addf %36, %38 : vector<32x128xf32>
    %cst_36 = arith.constant 0.000000e+00 : f32
    %40 = vector.broadcast %cst_36 : f32 to vector<32x128xf32>
    %41 = arith.maximumf %39, %40 : vector<32x128xf32>
    %42 = arith.addf %41, %19 : vector<32x128xf32>
    %cst_37 = arith.constant 0.000000e+00 : f32
    %43 = vector.broadcast %cst_37 : f32 to vector<32x128xf32>
    %44 = arith.maximumf %42, %43 : vector<32x128xf32>
    %c0_38 = arith.constant 0 : index
    %c0_39 = arith.constant 0 : index
    %45 = vector.load %arg10[%c0_38, %c0_39] : memref<32x128xf32, #tpu.memory_space<vmem>>, vector<32x128xf32>
    tpu.vector_store %arg10[%c0_38, %c0_39], %44 {strides = array<i32>} : memref<32x128xf32, #tpu.memory_space<vmem>>, vector<32x128xf32>,
    return
  }
  func.func @transform_0(%arg0: i32) -> (i32, i32) {
    %c0_i32 = arith.constant 0 : i32
    %c0_i32_0 = arith.constant 0 : i32
    return %arg0, %c0_i32 : i32, i32
  }
  func.func @transform_1(%arg0: i32) -> (i32, i32) {
    %c0_i32 = arith.constant 0 : i32
    %c0_i32_0 = arith.constant 0 : i32
    %c0_i32_1 = arith.constant 0 : i32
    return %c0_i32, %c0_i32_0 : i32, i32
  }
  func.func @transform_2(%arg0: i32) -> (i32, i32) {
    %c0_i32 = arith.constant 0 : i32
    %c0_i32_0 = arith.constant 0 : i32
    %c0_i32_1 = arith.constant 0 : i32
    return %c0_i32, %c0_i32_0 : i32, i32
  }
  func.func @transform_3(%arg0: i32) -> (i32, i32) {
    %c0_i32 = arith.constant 0 : i32
    %c0_i32_0 = arith.constant 0 : i32
    %c0_i32_1 = arith.constant 0 : i32
    return %c0_i32, %c0_i32_0 : i32, i32
  }
  func.func @transform_4(%arg0: i32) -> (i32, i32) {
    %c0_i32 = arith.constant 0 : i32
    %c0_i32_0 = arith.constant 0 : i32
    %c0_i32_1 = arith.constant 0 : i32
    return %c0_i32, %c0_i32_0 : i32, i32
  }
  func.func @transform_5(%arg0: i32) -> (i32, i32) {
    %c0_i32 = arith.constant 0 : i32
    %c0_i32_0 = arith.constant 0 : i32
    %c0_i32_1 = arith.constant 0 : i32
    return %c0_i32, %c0_i32_0 : i32, i32
  }
  func.func @transform_6(%arg0: i32) -> (i32, i32) {
    %c0_i32 = arith.constant 0 : i32
    %c0_i32_0 = arith.constant 0 : i32
    %c0_i32_1 = arith.constant 0 : i32
    return %c0_i32, %c0_i32_0 : i32, i32
  }
  func.func @transform_7(%arg0: i32) -> (i32, i32) {
    %c0_i32 = arith.constant 0 : i32
    %c0_i32_0 = arith.constant 0 : i32
    %c0_i32_1 = arith.constant 0 : i32
    return %c0_i32, %c0_i32_0 : i32, i32
  }
  func.func @transform_8(%arg0: i32) -> (i32, i32) {
    %c0_i32 = arith.constant 0 : i32
    %c0_i32_0 = arith.constant 0 : i32
    %c0_i32_1 = arith.constant 0 : i32
    return %c0_i32, %c0_i32_0 : i32, i32
  }
  func.func @transform_9(%arg0: i32) -> (i32, i32) {
    %c0_i32 = arith.constant 0 : i32
    %c0_i32_0 = arith.constant 0 : i32
    return %arg0, %c0_i32 : i32, i32
  }
}

module attributes {stable_mosaic.version = 11 : i64} {
  func.func @_resblock_kernel(%arg0: i32, %arg1: memref<32x192xf32, #tpu.memory_space<vmem>>, %arg2: memref<192x256xbf16, #tpu.memory_space<vmem>>, %arg3: memref<1x128xf32, #tpu.memory_space<vmem>>, %arg4: memref<1x128xf32, #tpu.memory_space<vmem>>, %arg5: memref<384x128xbf16, #tpu.memory_space<vmem>>, %arg6: memref<1x128xf32, #tpu.memory_space<vmem>>, %arg7: memref<1x128xf32, #tpu.memory_space<vmem>>, %arg8: memref<1x128xf32, #tpu.memory_space<vmem>>, %arg9: memref<1x128xf32, #tpu.memory_space<vmem>>, %arg10: memref<32x128xf32, #tpu.memory_space<vmem>>, %arg11: memref<2x18x128xf32, #tpu.memory_space<vmem>>) attributes {dimension_semantics = [#tpu.dimension_semantics<parallel>], iteration_bounds = array<i64: 1>, scalar_prefetch = 0 : i64, scratch_operands = 1 : i64, tpu.core_type = #tpu.core_type<tc>, window_params = [{transform_indices = @transform_0, window_bounds = array<i64: 32, 192>}, {pipeline_mode = #tpu.pipeline_mode<synchronous>, transform_indices = @transform_1, window_bounds = array<i64: 192, 256>}, {pipeline_mode = #tpu.pipeline_mode<synchronous>, transform_indices = @transform_2, window_bounds = array<i64: 1, 128>}, {pipeline_mode = #tpu.pipeline_mode<synchronous>, transform_indices = @transform_3, window_bounds = array<i64: 1, 128>}, {pipeline_mode = #tpu.pipeline_mode<synchronous>, transform_indices = @transform_4, window_bounds = array<i64: 384, 128>}, {pipeline_mode = #tpu.pipeline_mode<synchronous>, transform_indices = @transform_5, window_bounds = array<i64: 1, 128>}, {pipeline_mode = #tpu.pipeline_mode<synchronous>, transform_indices = @transform_6, window_bounds = array<i64: 1, 128>}, {pipeline_mode = #tpu.pipeline_mode<synchronous>, transform_indices = @transform_7, window_bounds = array<i64: 1, 128>}, {pipeline_mode = #tpu.pipeline_mode<synchronous>, transform_indices = @transform_8, window_bounds = array<i64: 1, 128>}, {transform_indices = @transform_9, window_bounds = array<i64: 32, 128>}]} {
    %c0 = arith.constant 0 : index
    %c0_0 = arith.constant 0 : index
    %0 = vector.load %arg1[%c0, %c0_0] : memref<32x192xf32, #tpu.memory_space<vmem>>, vector<32x192xf32>
    %1 = arith.truncf %0 : vector<32x192xf32> to vector<32x192xbf16>
    %c0_1 = arith.constant 0 : index
    %c0_2 = arith.constant 0 : index
    %2 = vector.load %arg2[%c0_1, %c0_2] : memref<192x256xbf16, #tpu.memory_space<vmem>>, vector<192x256xbf16>
    %cst = arith.constant dense<0.000000e+00> : vector<32x256xf32>
    %3 = tpu.matmul %1, %2, %cst {dimension_numbers = #tpu.dot_dimension_numbers<[1], [0], [0], [1], [0, 0, 1, 1], [], []>} : vector<32x192xbf16>, vector<192x256xbf16>, vector<32x256xf32> -> vector<32x256xf32>
    %4 = vector.extract_strided_slice %3 {offsets = [0, 0], sizes = [32, 128], strides = [1, 1]} : vector<32x256xf32> to vector<32x128xf32>
    %c0_3 = arith.constant 0 : index
    %c0_4 = arith.constant 0 : index
    %5 = vector.load %arg3[%c0_3, %c0_4] : memref<1x128xf32, #tpu.memory_space<vmem>>, vector<1x128xf32>
    %6 = vector.broadcast %5 : vector<1x128xf32> to vector<32x128xf32>
    %7 = arith.mulf %4, %6 : vector<32x128xf32>
    %c0_5 = arith.constant 0 : index
    %c0_6 = arith.constant 0 : index
    %8 = vector.load %arg4[%c0_5, %c0_6] : memref<1x128xf32, #tpu.memory_space<vmem>>, vector<1x128xf32>
    %9 = vector.broadcast %8 : vector<1x128xf32> to vector<32x128xf32>
    %10 = arith.addf %7, %9 : vector<32x128xf32>
    %cst_7 = arith.constant 0.000000e+00 : f32
    %11 = vector.broadcast %cst_7 : f32 to vector<32x128xf32>
    %12 = arith.maximumf %10, %11 : vector<32x128xf32>
    %13 = vector.extract_strided_slice %3 {offsets = [0, 128], sizes = [32, 128], strides = [1, 1]} : vector<32x256xf32> to vector<32x128xf32>
    %c0_8 = arith.constant 0 : index
    %c0_9 = arith.constant 0 : index
    %14 = vector.load %arg8[%c0_8, %c0_9] : memref<1x128xf32, #tpu.memory_space<vmem>>, vector<1x128xf32>
    %15 = vector.broadcast %14 : vector<1x128xf32> to vector<32x128xf32>
    %16 = arith.mulf %13, %15 : vector<32x128xf32>
    %c0_10 = arith.constant 0 : index
    %c0_11 = arith.constant 0 : index
    %17 = vector.load %arg9[%c0_10, %c0_11] : memref<1x128xf32, #tpu.memory_space<vmem>>, vector<1x128xf32>
    %18 = vector.broadcast %17 : vector<1x128xf32> to vector<32x128xf32>
    %19 = arith.addf %16, %18 : vector<32x128xf32>
    %cst_12 = arith.constant 0.000000e+00 : f32
    %20 = vector.broadcast %cst_12 : f32 to vector<2x1x128xf32>
    %c0_13 = arith.constant 0 : index
    %c0_14 = arith.constant 0 : index
    %c0_15 = arith.constant 0 : index
    %21 = vector.load %arg11[%c0_13, %c0_14, %c0_15] : memref<2x18x128xf32, #tpu.memory_space<vmem>>, vector<2x1x128xf32>
    tpu.vector_store %arg11[%c0_13, %c0_14, %c0_15], %20 {strides = array<i32>} : memref<2x18x128xf32, #tpu.memory_space<vmem>>, vector<2x1x128xf32>,
    %cst_16 = arith.constant 0.000000e+00 : f32
    %22 = vector.broadcast %cst_16 : f32 to vector<2x1x128xf32>
    %c0_17 = arith.constant 0 : index
    %c17 = arith.constant 17 : index
    %c0_18 = arith.constant 0 : index
    %23 = vector.load %arg11[%c0_17, %c17, %c0_18] : memref<2x18x128xf32, #tpu.memory_space<vmem>>, vector<2x1x128xf32>
    tpu.vector_store %arg11[%c0_17, %c17, %c0_18], %22 {strides = array<i32>} : memref<2x18x128xf32, #tpu.memory_space<vmem>>, vector<2x1x128xf32>,
    %24 = vector.shape_cast %12 : vector<32x128xf32> to vector<2x16x128xf32>
    %c0_19 = arith.constant 0 : index
    %c1 = arith.constant 1 : index
    %c0_20 = arith.constant 0 : index
    %25 = vector.load %arg11[%c0_19, %c1, %c0_20] : memref<2x18x128xf32, #tpu.memory_space<vmem>>, vector<2x16x128xf32>
    tpu.vector_store %arg11[%c0_19, %c1, %c0_20], %24 {strides = array<i32>} : memref<2x18x128xf32, #tpu.memory_space<vmem>>, vector<2x16x128xf32>,
    %c0_21 = arith.constant 0 : index
    %c0_22 = arith.constant 0 : index
    %c0_23 = arith.constant 0 : index
    %26 = vector.load %arg11[%c0_21, %c0_22, %c0_23] : memref<2x18x128xf32, #tpu.memory_space<vmem>>, vector<2x16x128xf32>
    %c0_24 = arith.constant 0 : index
    %c1_25 = arith.constant 1 : index
    %c0_26 = arith.constant 0 : index
    %27 = vector.load %arg11[%c0_24, %c1_25, %c0_26] : memref<2x18x128xf32, #tpu.memory_space<vmem>>, vector<2x16x128xf32>
    %c0_27 = arith.constant 0 : index
    %c2 = arith.constant 2 : index
    %c0_28 = arith.constant 0 : index
    %28 = vector.load %arg11[%c0_27, %c2, %c0_28] : memref<2x18x128xf32, #tpu.memory_space<vmem>>, vector<2x16x128xf32>
    %29 = tpu.concatenate %26, %27, %28 in 2 : vector<2x16x128xf32>, vector<2x16x128xf32>, vector<2x16x128xf32> -> vector<2x16x384xf32>
    %30 = vector.shape_cast %29 : vector<2x16x384xf32> to vector<32x384xf32>
    %31 = arith.truncf %30 : vector<32x384xf32> to vector<32x384xbf16>
    %c0_29 = arith.constant 0 : index
    %c0_30 = arith.constant 0 : index
    %32 = vector.load %arg5[%c0_29, %c0_30] : memref<384x128xbf16, #tpu.memory_space<vmem>>, vector<384x128xbf16>
    %cst_31 = arith.constant dense<0.000000e+00> : vector<32x128xf32>
    %33 = tpu.matmul %31, %32, %cst_31 {dimension_numbers = #tpu.dot_dimension_numbers<[1], [0], [0], [1], [0, 0, 1, 1], [], []>} : vector<32x384xbf16>, vector<384x128xbf16>, vector<32x128xf32> -> vector<32x128xf32>
    %c0_32 = arith.constant 0 : index
    %c0_33 = arith.constant 0 : index
    %34 = vector.load %arg6[%c0_32, %c0_33] : memref<1x128xf32, #tpu.memory_space<vmem>>, vector<1x128xf32>
    %35 = vector.broadcast %34 : vector<1x128xf32> to vector<32x128xf32>
    %36 = arith.mulf %33, %35 : vector<32x128xf32>
    %c0_34 = arith.constant 0 : index
    %c0_35 = arith.constant 0 : index
    %37 = vector.load %arg7[%c0_34, %c0_35] : memref<1x128xf32, #tpu.memory_space<vmem>>, vector<1x128xf32>
    %38 = vector.broadcast %37 : vector<1x128xf32> to vector<32x128xf32>
    %39 = arith.addf %36, %38 : vector<32x128xf32>
    %cst_36 = arith.constant 0.000000e+00 : f32
    %40 = vector.broadcast %cst_36 : f32 to vector<32x128xf32>
    %41 = arith.maximumf %39, %40 : vector<32x128xf32>
    %42 = arith.addf %41, %19 : vector<32x128xf32>
    %cst_37 = arith.constant 0.000000e+00 : f32
    %43 = vector.broadcast %cst_37 : f32 to vector<32x128xf32>
    %44 = arith.maximumf %42, %43 : vector<32x128xf32>
    %c0_38 = arith.constant 0 : index
    %c0_39 = arith.constant 0 : index
    %45 = vector.load %arg10[%c0_38, %c0_39] : memref<32x128xf32, #tpu.memory_space<vmem>>, vector<32x128xf32>
    tpu.vector_store %arg10[%c0_38, %c0_39], %44 {strides = array<i32>} : memref<32x128xf32, #tpu.memory_space<vmem>>, vector<32x128xf32>,
    return
  }
  func.func @transform_0(%arg0: i32) -> (i32, i32) {
    %c0_i32 = arith.constant 0 : i32
    %c0_i32_0 = arith.constant 0 : i32
    return %arg0, %c0_i32 : i32, i32
  }
  func.func @transform_1(%arg0: i32) -> (i32, i32) {
    %c0_i32 = arith.constant 0 : i32
    %c0_i32_0 = arith.constant 0 : i32
    %c0_i32_1 = arith.constant 0 : i32
    return %c0_i32, %c0_i32_0 : i32, i32
  }
  func.func @transform_2(%arg0: i32) -> (i32, i32) {
    %c0_i32 = arith.constant 0 : i32
    %c0_i32_0 = arith.constant 0 : i32
    %c0_i32_1 = arith.constant 0 : i32
    return %c0_i32, %c0_i32_0 : i32, i32
  }
  func.func @transform_3(%arg0: i32) -> (i32, i32) {
    %c0_i32 = arith.constant 0 : i32
    %c0_i32_0 = arith.constant 0 : i32
    %c0_i32_1 = arith.constant 0 : i32
    return %c0_i32, %c0_i32_0 : i32, i32
  }
  func.func @transform_4(%arg0: i32) -> (i32, i32) {
    %c0_i32 = arith.constant 0 : i32
    %c0_i32_0 = arith.constant 0 : i32
    %c0_i32_1 = arith.constant 0 : i32
    return %c0_i32, %c0_i32_0 : i32, i32
  }
  func.func @transform_5(%arg0: i32) -> (i32, i32) {
    %c0_i32 = arith.constant 0 : i32
    %c0_i32_0 = arith.constant 0 : i32
    %c0_i32_1 = arith.constant 0 : i32
    return %c0_i32, %c0_i32_0 : i32, i32
  }
  func.func @transform_6(%arg0: i32) -> (i32, i32) {
    %c0_i32 = arith.constant 0 : i32
    %c0_i32_0 = arith.constant 0 : i32
    %c0_i32_1 = arith.constant 0 : i32
    return %c0_i32, %c0_i32_0 : i32, i32
  }
  func.func @transform_7(%arg0: i32) -> (i32, i32) {
    %c0_i32 = arith.constant 0 : i32
    %c0_i32_0 = arith.constant 0 : i32
    %c0_i32_1 = arith.constant 0 : i32
    return %c0_i32, %c0_i32_0 : i32, i32
  }
  func.func @transform_8(%arg0: i32) -> (i32, i32) {
    %c0_i32 = arith.constant 0 : i32
    %c0_i32_0 = arith.constant 0 : i32
    %c0_i32_1 = arith.constant 0 : i32
    return %c0_i32, %c0_i32_0 : i32, i32
  }
  func.func @transform_9(%arg0: i32) -> (i32, i32) {
    %c0_i32 = arith.constant 0 : i32
    %c0_i32_0 = arith.constant 0 : i32
    return %arg0, %c0_i32 : i32, i32
  }
}

</mosaic_0001>

<bundles_post_ra>
// kernel: tile.33
= control target key start
LH: loop header
LB: loop body
LE: loop exit
PB: predicated region body
PF: predicated region fallthrough
CT: control target
= control target key end

     0   :  { %s28_s0 = inlined_call_operand.vmem [shape: f32[8], index: 0, kind: input, shape index: {}]   ;;  %s29_s1 = inlined_call_operand.vmem [shape: f32[16,8], index: 1, kind: output, shape index: {}]  }
   0x1   :  { %v4_v0 = vld [vmem:[%s28_s0] ss:$0 sm:$0xff] }
   0x2   :  { %5 = vst [vmem:[%s29_s1] sm:$0xff] %v4_v0  ;;  %8 = vst [vmem:[%s29_s1 + $0x8] sm:$0xff] %v4_v0 }

// kernel: tile.34
= control target key start
LH: loop header
LB: loop body
LE: loop exit
PB: predicated region body
PF: predicated region fallthrough
CT: control target
= control target key end

     0   :  { %s133_s10 = smov 120   ;;  %s134_s11 = smov 104   ;;  %vm3_vm0 = vcmask 64512   ;;  %vm9_vm1 = vcmask 1048512   ;;  %vm15_vm2 = vcmask 982912   ;;  %vm21_vm3 = vcmask 917312   ;;  %s209_s0 = inlined_call_operand.vmem [shape: f32[16,8], index: 0, kind: input, shape index: {}]   ;;  %s210_s1 = inlined_call_operand.vmem [shape: f32[1,128], index: 1, kind: output, shape index: {}]  }
   0x1   :  { %v103_v0 = vld [vmem:[%s209_s0 + $0xf] sm:$0x1]   ;;  %v105_v1 = vld [vmem:[%s209_s0 + $0xd] sm:$0x1]   ;;  %v104_v2 = vld [vmem:[%s209_s0 + $0xe] sm:$0x1]  }
   0x2   :  { %7 = vrot.lane.b32.xlu0 %v103_v0, %s133_s10  ;;  %19 = vrot.lane.b32.xlu1 %v105_v1, %s134_s11  ;;  %v106_v3 = vld [vmem:[%s209_s0 + $0xc] sm:$0x1]   ;;  %s135_s16 = smov 112   ;;  %s136_s17 = smov 96   ;;  %v107_v4 = vld [vmem:[%s209_s0 + $0xb] sm:$0x1]  }
   0x3   :  { %v108_v5 = vld [vmem:[%s209_s0 + $0xa] sm:$0x1]   ;;  %v2_v6 = vld [vmem:[%s209_s0] sm:$0x1]   ;;  %s137_s24 = smov 88   ;;  %s138_s25 = smov 80  }
   0x4   :  { %4 = vst.msk [vmem:[#allocation0] sm:$0x1] %vm3_vm0, %v2_v6   ;;  %v109_v7 = vld [vmem:[%s209_s0 + $0x9] sm:$0x1]   ;;  %v110_v8 = vld [vmem:[%s209_s0 + $0x8] sm:$0x1]  }
   0x5   :  { %s139_s30 = smov 72   ;;  %s140_s2 = smov 64   ;;  %v111_v9 = vld [vmem:[%s209_s0 + $0x7] sm:$0x1]   ;;  %v112_v10 = vld [vmem:[%s209_s0 + $0x6] sm:$0x1]  }
   0x6   :  { %13 = vrot.lane.b32.xlu0 %v104_v2, %s135_s16  ;;  %25 = vrot.lane.b32.xlu1 %v106_v3, %s136_s17  ;;  %s141_s7 = smov 56   ;;  %s142_s8 = smov 48   ;;  %v113_v11 = vld [vmem:[%s209_s0 + $0x5] sm:$0x1]   ;;  %v114_v12 = vld [vmem:[%s209_s0 + $0x4] sm:$0x1]  }
   0x7   :  { %s143_s13 = smov 40   ;;  %s144_s14 = smov 32   ;;  %v115_v13 = vld [vmem:[%s209_s0 + $0x3] sm:$0x1]   ;;  %v116_v14 = vld [vmem:[%s209_s0 + $0x2] sm:$0x1]  }
   0x8   :  { %s145_s19 = smov 24   ;;  %s146_s20 = smov 16   ;;  %v117_v15 = vld [vmem:[%s209_s0 + $0x1] sm:$0x1]   ;;  %vm27_vm4 = vcmask 851712   ;;  %vm33_vm5 = vcmask 786112  }
   0x9   :  { %s147_s0 = smov 8   ;;  %vm39_vm6 = vcmask 720512   ;;  %vm45_vm7 = vcmask 654912   ;;  %vm51_vm8 = vcmask 589312   ;;  %vm57_vm9 = vcmask 523712  }
   0xa   :  { %31 = vrot.lane.b32.xlu0 %v107_v4, %s137_s24  ;;  %37 = vrot.lane.b32.xlu1 %v108_v5, %s138_s25  ;;  %vm63_vm10 = vcmask 458112   ;;  %vm69_vm11 = vcmask 392512   ;;  %vm75_vm12 = vcmask 326912   ;;  %vm81_vm13 = vcmask 261312  }
   0xb   :  { %vm87_vm14 = vcmask 195712   ;;  %vm93_vm15 = vcmask 130112  }
   0xe   :  { %43 = vrot.lane.b32.xlu0 %v109_v7, %s139_s30  ;;  %49 = vrot.lane.b32.xlu1 %v110_v8, %s140_s2 }
  0x12   :  { %55 = vrot.lane.b32.xlu0 %v111_v9, %s141_s7  ;;  %61 = vrot.lane.b32.xlu1 %v112_v10, %s142_s8 }
  0x16   :  { %67 = vrot.lane.b32.xlu0 %v113_v11, %s143_s13  ;;  %73 = vrot.lane.b32.xlu1 %v114_v12, %s144_s14 }
  0x1a   :  { %79 = vrot.lane.b32.xlu0 %v115_v13, %s145_s19  ;;  %85 = vrot.lane.b32.xlu1 %v116_v14, %s146_s20 }
  0x1e   :  { %91 = vrot.lane.b32.xlu0 %v117_v15, %s147_s0 }
  0x74   :  { %v8_v16 = vpop.permute.xlu0 %7   ;;  %v20_v17 = vpop.permute.xlu1 %19  }
  0x75   :  { %10 = vst.msk [vmem:[#allocation0] sm:$0x1] %vm9_vm1, %v8_v16  }
  0x78   :  { %v14_v18 = vpop.permute.xlu0 %13   ;;  %v26_v19 = vpop.permute.xlu1 %25  }
  0x79   :  { %16 = vst.msk [vmem:[#allocation0] sm:$0x1] %vm15_vm2, %v14_v18  }
  0x7a   :  { %22 = vst.msk [vmem:[#allocation0] sm:$0x1] %vm21_vm3, %v20_v17  }
  0x7b   :  { %28 = vst.msk [vmem:[#allocation0] sm:$0x1] %vm27_vm4, %v26_v19  }
  0x7c   :  { %v32_v20 = vpop.permute.xlu0 %31   ;;  %v38_v21 = vpop.permute.xlu1 %37  }
  0x7d   :  { %34 = vst.msk [vmem:[#allocation0] sm:$0x1] %vm33_vm5, %v32_v20  }
  0x7e   :  { %40 = vst.msk [vmem:[#allocation0] sm:$0x1] %vm39_vm6, %v38_v21  }
  0x80   :  { %v44_v22 = vpop.permute.xlu0 %43   ;;  %v50_v23 = vpop.permute.xlu1 %49  }
  0x81   :  { %46 = vst.msk [vmem:[#allocation0] sm:$0x1] %vm45_vm7, %v44_v22  }
  0x82   :  { %52 = vst.msk [vmem:[#allocation0] sm:$0x1] %vm51_vm8, %v50_v23  }
  0x84   :  { %v56_v24 = vpop.permute.xlu0 %55   ;;  %v62_v25 = vpop.permute.xlu1 %61  }
  0x85   :  { %58 = vst.msk [vmem:[#allocation0] sm:$0x1] %vm57_vm9, %v56_v24  }
  0x86   :  { %64 = vst.msk [vmem:[#allocation0] sm:$0x1] %vm63_vm10, %v62_v25  }
  0x88   :  { %v68_v26 = vpop.permute.xlu0 %67   ;;  %v74_v27 = vpop.permute.xlu1 %73  }
  0x89   :  { %70 = vst.msk [vmem:[#allocation0] sm:$0x1] %vm69_vm11, %v68_v26  }
  0x8a   :  { %76 = vst.msk [vmem:[#allocation0] sm:$0x1] %vm75_vm12, %v74_v27  }
  0x8c   :  { %v80_v28 = vpop.permute.xlu0 %79   ;;  %v86_v29 = vpop.permute.xlu1 %85  }
  0x8d   :  { %82 = vst.msk [vmem:[#allocation0] sm:$0x1] %vm81_vm13, %v80_v28  }
  0x8e   :  { %88 = vst.msk [vmem:[#allocation0] sm:$0x1] %vm87_vm14, %v86_v29  }
  0x90   :  { %v92_v30 = vpop.permute.xlu0 %91  }
  0x91   :  { %94 = vst.msk [vmem:[#allocation0] sm:$0x1] %vm93_vm15, %v92_v30  }
  0x98   :  { %v99_v31 = vld [vmem:[#allocation0] sm:$0x1] }
  0x99   :  { %102 = vst [vmem:[%s210_s1] sm:$0x1] %v99_v31 }

// kernel: residual_block_pallas.1
= control target key start
LH: loop header
LB: loop body
LE: loop exit
PB: predicated region body
PF: predicated region fallthrough
CT: control target
= control target key end

     0   :  { %vm189_vm0 = vcmask 523264   ;;  %v830_v48 = vmov 0.0   ;;  %s1090_s1 = inlined_call_operand.vmem [shape: bf16[192,256], index: 1, kind: input, shape index: {}]   ;;  %s1091_s0 = inlined_call_operand.vmem [shape: f32[32,192], index: 0, kind: input, shape index: {}]   ;;  %s1092_s4 = inlined_call_operand.vmem [shape: bf16[384,128], index: 4, kind: input, shape index: {}]   ;;  %s1093_s2 = inlined_call_operand.vmem [shape: f32[1,128], index: 2, kind: input, shape index: {}]   ;;  %s1094_s3 = inlined_call_operand.vmem [shape: f32[1,128], index: 3, kind: input, shape index: {}]   ;;  %s1095_s5 = inlined_call_operand.vmem [shape: f32[1,128], index: 5, kind: input, shape index: {}]   ;;  %s1096_s7 = inlined_call_operand.vmem [shape: f32[1,128], index: 7, kind: input, shape index: {}]   ;;  %s1097_s6 = inlined_call_operand.vmem [shape: f32[1,128], index: 6, kind: input, shape index: {}]   ;;  %s1098_s8 = inlined_call_operand.vmem [shape: f32[1,128], index: 8, kind: input, shape index: {}]   ;;  %s1099_s9 = inlined_call_operand.vmem [shape: f32[32,128], index: 9, kind: output, shape index: {}]  }
   0x1   :  { %v770_v0 = vld [vmem:[%s1090_s1 + $0x74] ss:$8 sps:$4 sm:$0xff]   ;;  %v772_v1 = vld [vmem:[%s1090_s1 + $0x70] ss:$8 sps:$4 sm:$0xff]   ;;  %v773_v2 = vld [vmem:[%s1090_s1 + $0x64] ss:$8 sps:$4 sm:$0xff]  }
   0x2   :  { %196 = vmatprep.subr.bf16.mxu0 %v770_v0  ;;  %v775_v3 = vld [vmem:[%s1090_s1 + $0x60] ss:$8 sps:$4 sm:$0xff]   ;;  %v776_v4 = vld [vmem:[%s1090_s1 + $0x54] ss:$8 sps:$4 sm:$0xff]   ;;  %v778_v5 = vld [vmem:[%s1090_s1 + $0x50] ss:$8 sps:$4 sm:$0xff]  }
   0x3   :  { %197 = vmatpush1.bf16.msra.mxu0 %v772_v1  ;;  %v779_v6 = vld [vmem:[%s1090_s1 + $0x44] ss:$8 sps:$4 sm:$0xff]   ;;  %v781_v7 = vld [vmem:[%s1090_s1 + $0x40] ss:$8 sps:$4 sm:$0xff]   ;;  %v782_v8 = vld [vmem:[%s1090_s1 + $0x34] ss:$8 sps:$4 sm:$0xff]  }
   0x4   :  { %198 = vmatprep.subr.bf16.mxu0 %v773_v2  ;;  %v784_v9 = vld [vmem:[%s1090_s1 + $0x30] ss:$8 sps:$4 sm:$0xff]   ;;  %v785_v10 = vld [vmem:[%s1090_s1 + $0x24] ss:$8 sps:$4 sm:$0xff]   ;;  %v787_v14 = vld [vmem:[%s1090_s1 + $0x20] ss:$8 sps:$4 sm:$0xff]  }
   0x5   :  { %v34_v11 = vld [vmem:[%s1091_s0 + $0x8] sm:$0xff]  ;;  %v36_v12 = vld [vmem:[%s1091_s0 + $0x18] sm:$0xff]  ;;  %v808_v19 = vld [vmem:[%s1092_s4 + $0x70] sm:$0xff]   ;;  %297 = vst [vmem:[#allocation2] sm:$0x1] %v830_v48 }
   0x6   :  { %v42_v13 = vpack.c.bf16 %v36_v12, %v34_v11  ;;  %v788_v15 = vld [vmem:[%s1090_s1 + $0x14] ss:$8 sps:$4 sm:$0xff]   ;;  %v790_v18 = vld [vmem:[%s1090_s1 + $0x10] ss:$8 sps:$4 sm:$0xff]   ;;  %v791_v20 = vld [vmem:[%s1090_s1 + $0x4] ss:$8 sps:$4 sm:$0xff]  }
   0x7   :  { %199 = vmatpush1.bf16.msra.mxu0 %v775_v3  ;;  %v806_v16 = vld [vmem:[%s1092_s4 + $0x78] sm:$0xff]   ;;  %v809_v21 = vld [vmem:[%s1092_s4 + $0x30] sm:$0xff]   ;;  %v810_v22 = vld [vmem:[%s1092_s4 + $0x68] sm:$0xff]   ;;  %298 = vst [vmem:[#allocation2 + $0x18] sm:$0x1] %v830_v48 }
   0x8   :  { %200 = vmatprep.subr.bf16.mxu0 %v776_v4  ;;  %679 = vmatprep.mubr.msk.bf16.mxu0 %vm189_vm0, %v42_v13  ;;  %v807_v17 = vld [vmem:[%s1092_s4 + $0x38] sm:$0xff]   ;;  %v811_v23 = vld [vmem:[%s1092_s4 + $0x28] sm:$0xff]   ;;  %v33_v33 = vld [vmem:[%s1091_s0] sm:$0xff]  ;;  %299 = vst [vmem:[#allocation2 + $0x11] sm:$0x1] %v830_v48 }
   0x9   :  { %711 = vmatprep.subr.bf16.mxu1 %v806_v16  ;;  %v793_v24 = vld [vmem:[%s1090_s1] ss:$8 sps:$4 sm:$0xff]   ;;  %v794_v25 = vld [vmem:[%s1090_s1 + $0xb4] ss:$8 sps:$4 sm:$0xff]   ;;  %v796_v26 = vld [vmem:[%s1090_s1 + $0xb0] ss:$8 sps:$4 sm:$0xff]  }
   0xa   :  { %712 = vmatpush3.bf16.msra.mxu1 %v807_v17  ;;  %v797_v27 = vld [vmem:[%s1090_s1 + $0xa4] ss:$8 sps:$4 sm:$0xff]   ;;  %v799_v28 = vld [vmem:[%s1090_s1 + $0xa0] ss:$8 sps:$4 sm:$0xff]   ;;  %v800_v29 = vld [vmem:[%s1090_s1 + $0x94] ss:$8 sps:$4 sm:$0xff]  }
   0xb   :  { %201 = vmatpush1.bf16.msra.mxu0 %v778_v5  ;;  %713 = vmatprep.subr.bf16.mxu1 %v808_v19  ;;  %v802_v30 = vld [vmem:[%s1090_s1 + $0x90] ss:$8 sps:$4 sm:$0xff]   ;;  %v803_v31 = vld [vmem:[%s1090_s1 + $0x84] ss:$8 sps:$4 sm:$0xff]   ;;  %v805_v32 = vld [vmem:[%s1090_s1 + $0x80] ss:$8 sps:$4 sm:$0xff]  }
   0xc   :  { %202 = vmatprep.subr.bf16.mxu0 %v779_v6  ;;  %v35_v34 = vld [vmem:[%s1091_s0 + $0x10] sm:$0xff]  ;;  %v38_v35 = vld [vmem:[%s1091_s0 + $0x28] sm:$0xff]  ;;  %v40_v36 = vld [vmem:[%s1091_s0 + $0x38] sm:$0xff]  ;;  %300 = vst [vmem:[#allocation2 + $0x29] sm:$0x1] %v830_v48 }
   0xd   :  { %v41_v37 = vpack.c.bf16 %v35_v34, %v33_v33  ;;  %v44_v38 = vpack.c.bf16 %v40_v36, %v38_v35  ;;  %v37_v39 = vld [vmem:[%s1091_s0 + $0x20] sm:$0xff]  ;;  %v39_v40 = vld [vmem:[%s1091_s0 + $0x30] sm:$0xff]  ;;  %v814_v44 = vld [vmem:[%s1092_s4 + $0x58] sm:$0xff]  }
   0xe   :  { %714 = vmatpush3.bf16.msra.mxu1 %v809_v21  ;;  %v43_v41 = vpack.c.bf16 %v39_v40, %v37_v39  ;;  %v812_v42 = vld [vmem:[%s1092_s4 + $0x60] sm:$0xff]   ;;  %v815_v45 = vld [vmem:[%s1092_s4 + $0x18] sm:$0xff]   ;;  %v816_v46 = vld [vmem:[%s1092_s4 + $0x50] sm:$0xff]  }
   0xf   :  { %203 = vmatpush1.bf16.msra.mxu0 %v781_v7  ;;  %715 = vmatprep.subr.bf16.mxu1 %v810_v22  ;;  %v813_v43 = vld [vmem:[%s1092_s4 + $0x20] sm:$0xff]   ;;  %v817_v47 = vld [vmem:[%s1092_s4 + $0x10] sm:$0xff]   ;;  %v818_v49 = vld [vmem:[%s1092_s4 + $0x48] sm:$0xff]  }
  0x10   :  { %204 = vmatprep.subr.bf16.mxu0 %v782_v8  ;;  %v819_v50 = vld [vmem:[%s1092_s4 + $0x8] sm:$0xff]   ;;  %v820_v51 = vld [vmem:[%s1092_s4 + $0x40] sm:$0xff]   ;;  %v822_v53 = vld [vmem:[%s1092_s4 + $0xb8] sm:$0xff]  }
  0x11   :  { %v821_v52 = vld [vmem:[%s1092_s4] sm:$0xff]   ;;  %v824_v17 = vld [vmem:[%s1092_s4 + $0xa8] sm:$0xff]  }
  0x12   :  { %716 = vmatpush3.bf16.msra.mxu1 %v811_v23  ;;  %v681_v54 = vld [vmem:[%s1093_s2] ss:$0 sm:$0xff] }
  0x13   :  { %205 = vmatpush1.bf16.msra.mxu0 %v784_v9  ;;  %717 = vmatprep.subr.bf16.mxu1 %v812_v42  ;;  %v682_v56 = vld [vmem:[%s1094_s3] ss:$0 sm:$0xff] }
  0x14   :  { %206 = vmatprep.subr.bf16.mxu0 %v785_v10  ;;  %v825_v23 = vld [vmem:[%s1092_s4 + $0xa0] sm:$0xff]  }
  0x15   :  { %v709_v42 = vld [vmem:[%s1095_s5] ss:$0 sm:$0xff] }
  0x16   :  { %718 = vmatpush3.bf16.msra.mxu1 %v813_v43  ;;  %v683_v43 = vld [vmem:[%s1096_s7] ss:$0 sm:$0xff] }
  0x17   :  { %207 = vmatpush1.bf16.msra.mxu0 %v787_v14  ;;  %719 = vmatprep.subr.bf16.mxu1 %v814_v44 }
  0x18   :  { %208 = vmatprep.subr.bf16.mxu0 %v788_v15  ;;  %v823_v15 = vld [vmem:[%s1092_s4 + $0xb0] sm:$0xff]  }
  0x1a   :  { %720 = vmatpush3.bf16.msra.mxu1 %v815_v45 }
  0x1b   :  { %209 = vmatpush1.bf16.msra.mxu0 %v790_v18  ;;  %721 = vmatprep.subr.bf16.mxu1 %v816_v46 }
  0x1c   :  { %210 = vmatprep.subr.bf16.mxu0 %v791_v20 }
  0x1e   :  { %722 = vmatpush3.bf16.msra.mxu1 %v817_v47  ;;  %v710_v47 = vld [vmem:[%s1097_s6] ss:$0 sm:$0xff] }
  0x1f   :  { %211 = vmatpush1.bf16.msra.mxu0 %v793_v24  ;;  %723 = vmatprep.subr.bf16.mxu1 %v818_v49 }
  0x20   :  { %220 = vmatprep.subr.bf16.mxu0 %v794_v25  ;;  %v826_v25 = vld [vmem:[%s1092_s4 + $0x98] sm:$0xff]  }
  0x22   :  { %724 = vmatpush3.bf16.msra.mxu1 %v819_v50 }
  0x23   :  { %221 = vmatpush2.bf16.msra.mxu0 %v796_v26  ;;  %725 = vmatprep.subr.bf16.mxu1 %v820_v51  ;;  %v827_v26 = vld [vmem:[%s1092_s4 + $0x90] sm:$0xff]  }
  0x24   :  { %222 = vmatprep.subr.bf16.mxu0 %v797_v27  ;;  %v828_v27 = vld [vmem:[%s1092_s4 + $0x88] sm:$0xff]  }
  0x26   :  { %726 = vmatpush3.bf16.msra.mxu1 %v821_v52 }
  0x27   :  { %223 = vmatpush2.bf16.msra.mxu0 %v799_v28  ;;  %749 = vmatprep.subr.bf16.mxu1 %v822_v53  ;;  %v829_v28 = vld [vmem:[%s1092_s4 + $0x80] sm:$0xff]  }
  0x28   :  { %224 = vmatprep.subr.bf16.mxu0 %v800_v29 }
  0x2b   :  { %225 = vmatpush2.bf16.msra.mxu0 %v802_v30 }
  0x2c   :  { %226 = vmatprep.subr.bf16.mxu0 %v803_v31 }
  0x2f   :  { %227 = vmatpush2.bf16.msra.mxu0 %v805_v32 }
  0x32   :  { %229 = vmatmul.mubr.bf16.vlgmr.msra.gmra.mxu0 %v41_v37 }
  0x33   :  { %680 = vmatprep.mubr.msk.bf16.mxu0 %vm189_vm0, %v44_v38 }
  0x3a   :  { %239 = vmatmul.mubr.bf16.gmra.mxu0 %v43_v41 }
  0xf2   :  { %v230_v55 = vpop.f32.mrf.mxu0 }
  0xf3   :  { %v256_v57 = vmul.f32 %v681_v54, %v230_v55  ;;  %v684_v55 = vld [vmem:[%s1098_s8] ss:$0 sm:$0xff] }
  0xf4   :  { %v1036_v58 = vpop.f32.mrf.mxu0 }
  0xf5   :  { %v267_v59 = vadd.f32 %v682_v56, %v256_v57 }
  0xf6   :  { %v234_v60 = vpop.f32.mrf.mxu0 }
  0xf7   :  { %v271_v61 = vmax.f32 %v267_v59, 0.0  ;;  %v257_v62 = vmul.f32 %v681_v54, %v234_v60 }
  0xf8   :  { %v1038_v63 = vpop.f32.mrf.mxu0 }
  0xf9   :  { %301 = vst [vmem:[#allocation2 + $0x1] sm:$0xff] %v271_v61  ;;  %v268_v0 = vadd.f32 %v682_v56, %v257_v62 }
  0xfa   :  { %v240_v1 = vpop.f32.mrf.mxu0 }
  0xfb   :  { %v272_v2 = vmax.f32 %v268_v0, 0.0  ;;  %v258_v3 = vmul.f32 %v681_v54, %v240_v1 }
  0xfc   :  { %v1040_v4 = vpop.f32.mrf.mxu0 }
  0xfd   :  { %302 = vst [vmem:[#allocation2 + $0x9] sm:$0xff] %v272_v2  ;;  %v269_v5 = vadd.f32 %v682_v56, %v258_v3  ;;  %v318_v6 = vpack.c.bf16 %v272_v2, %v271_v61  ;;  %v284_v46 = vmul.f32 %v683_v43, %v1040_v4 }
  0xfe   :  { %v244_v7 = vpop.f32.mrf.mxu0 }
  0xff   :  { %v273_v8 = vmax.f32 %v269_v5, 0.0  ;;  %v259_v9 = vmul.f32 %v681_v54, %v244_v7  ;;  %547 = vmatprep.mubr.bf16.mxu1 %v318_v6  ;;  %v295_v61 = vadd.f32 %v684_v55, %v284_v46  ;;  %v283_v6 = vmul.f32 %v683_v43, %v1038_v63 }
 0x100   :  { %v305_v12 = vld [vmem:[#allocation2] sm:$0xff]  ;;  %v246_v49 = vpop.f32.mrf.mxu0 }
 0x101   :  { %303 = vst [vmem:[#allocation2 + $0x19] sm:$0xff] %v273_v8  ;;  %v270_v10 = vadd.f32 %v682_v56, %v259_v9  ;;  %v285_v62 = vmul.f32 %v683_v43, %v246_v49 }
 0x103   :  { %v274_v11 = vmax.f32 %v270_v10, 0.0  ;;  %v296_v10 = vadd.f32 %v684_v55, %v285_v62 }
 0x104   :  { %v306_v13 = vld [vmem:[#allocation2 + $0x8] sm:$0xff] }
 0x105   :  { %304 = vst [vmem:[#allocation2 + $0x21] sm:$0xff] %v274_v11  ;;  %v317_v14 = vpack.c.bf16 %v306_v13, %v305_v12  ;;  %v321_v16 = vpack.c.bf16 %v274_v11, %v273_v8  ;;  %v313_v19 = vld [vmem:[#allocation2 + $0x2] sm:$0xff]  ;;  %v314_v20 = vld [vmem:[#allocation2 + $0xa] sm:$0xff] }
 0x106   :  { %v319_v24 = vpack.c.bf16 %v314_v20, %v313_v19 }
 0x107   :  { %548 = vmatmul.mubr.bf16.vlgmr.msra.gmra.mxu1 %v317_v14 }
 0x108   :  { %750 = vmatpush3.bf16.msra.mxu1 %v822_v53  ;;  %555 = vmatprep.mubr.bf16.mxu1 %v321_v16  ;;  %v307_v18 = vld [vmem:[#allocation2 + $0x18] sm:$0xff]  ;;  %v282_v53 = vmul.f32 %v683_v43, %v1036_v58 }
 0x109   :  { %751 = vmatprep.subr.bf16.mxu1 %v823_v15 }
 0x10a   :  { %v293_v5 = vadd.f32 %v684_v55, %v282_v53 }
 0x10c   :  { %752 = vmatpush3.bf16.msra.mxu1 %v823_v15  ;;  %v308_v21 = vld [vmem:[#allocation2 + $0x20] sm:$0xff]  ;;  %v294_v15 = vadd.f32 %v684_v55, %v283_v6 }
 0x10d   :  { %753 = vmatprep.subr.bf16.mxu1 %v824_v17  ;;  %v320_v22 = vpack.c.bf16 %v308_v21, %v307_v18  ;;  %v315_v29 = vld [vmem:[#allocation2 + $0x1a] sm:$0xff]  ;;  %v316_v30 = vld [vmem:[#allocation2 + $0x22] sm:$0xff] }
 0x10e   :  { %v322_v31 = vpack.c.bf16 %v316_v30, %v315_v29 }
 0x10f   :  { %556 = vmatmul.mubr.bf16.gmra.mxu1 %v320_v22 }
 0x110   :  { %754 = vmatpush3.bf16.msra.mxu1 %v824_v17  ;;  %765 = vmatprep.mubr.bf16.mxu1 %v319_v24 }
 0x111   :  { %755 = vmatprep.subr.bf16.mxu1 %v825_v23 }
 0x114   :  { %756 = vmatpush3.bf16.msra.mxu1 %v825_v23 }
 0x115   :  { %757 = vmatprep.subr.bf16.mxu1 %v826_v25 }
 0x118   :  { %758 = vmatpush3.bf16.msra.mxu1 %v826_v25 }
 0x119   :  { %759 = vmatprep.subr.bf16.mxu1 %v827_v26 }
 0x11c   :  { %760 = vmatpush3.bf16.msra.mxu1 %v827_v26 }
 0x11d   :  { %761 = vmatprep.subr.bf16.mxu1 %v828_v27 }
 0x120   :  { %762 = vmatpush3.bf16.msra.mxu1 %v828_v27 }
 0x121   :  { %763 = vmatprep.subr.bf16.mxu1 %v829_v28 }
 0x124   :  { %764 = vmatpush3.bf16.msra.mxu1 %v829_v28 }
 0x127   :  { %766 = vmatmul.mubr.bf16.vlgmr.msra.gmra.mxu1 %v322_v31 }
 0x1c7   :  { %v727_v32 = vpop.f32.mrf.mxu1 }
 0x1c9   :  { %v728_v33 = vpop.f32.mrf.mxu1 }
 0x1ca   :  { %v729_v44 = vadd.f32 %v728_v33, %v727_v32 }
 0x1cb   :  { %v730_v34 = vpop.f32.mrf.mxu1 }
 0x1cd   :  { %v731_v35 = vpop.f32.mrf.mxu1 }
 0x1ce   :  { %v732_v56 = vadd.f32 %v731_v35, %v730_v34 }
 0x1cf   :  { %v733_v36 = vpop.f32.mrf.mxu1 }
 0x1d1   :  { %v734_v37 = vpop.f32.mrf.mxu1 }
 0x1d2   :  { %v735_v40 = vadd.f32 %v734_v37, %v733_v36 }
 0x1d3   :  { %v736_v38 = vpop.f32.mrf.mxu1 }
 0x1d5   :  { %v737_v39 = vpop.f32.mrf.mxu1 }
 0x1d6   :  { %v738_v50 = vadd.f32 %v737_v39, %v736_v38 }
 0x1e7   :  { %v767_v41 = vpop.f32.mrf.mxu1 }
 0x1e8   :  { %v607_v45 = vadd.f32 %v767_v41, %v735_v40 }
 0x1e9   :  { %v598_v48 = vpop.f32.mrf.mxu1 }
 0x1ea   :  { %v622_v51 = vmul.f32 %v709_v42, %v607_v45  ;;  %v599_v52 = vadd.f32 %v729_v44, %v598_v48 }
 0x1eb   :  { %v768_v54 = vpop.f32.mrf.mxu1 }
 0x1ec   :  { %v633_v57 = vadd.f32 %v710_v47, %v622_v51  ;;  %v620_v59 = vmul.f32 %v709_v42, %v599_v52  ;;  %v610_v60 = vadd.f32 %v768_v54, %v738_v50 }
 0x1ed   :  { %v601_v0 = vpop.f32.mrf.mxu1 }
 0x1ee   :  { %v637_v1 = vmax.f32 %v633_v57, 0.0  ;;  %v631_v2 = vadd.f32 %v710_v47, %v620_v59  ;;  %v623_v3 = vmul.f32 %v709_v42, %v610_v60  ;;  %v602_v4 = vadd.f32 %v732_v56, %v601_v0 }
 0x1f0   :  { %v641_v58 = vadd.f32 %v637_v1, %v295_v61  ;;  %v635_v7 = vmax.f32 %v631_v2, 0.0  ;;  %v634_v8 = vadd.f32 %v710_v47, %v623_v3  ;;  %v621_v9 = vmul.f32 %v709_v42, %v602_v4 }
 0x1f2   :  { %v645_v11 = vmax.f32 %v641_v58, 0.0  ;;  %v639_v12 = vadd.f32 %v635_v7, %v293_v5  ;;  %v638_v13 = vmax.f32 %v634_v8, 0.0  ;;  %v632_v14 = vadd.f32 %v710_v47, %v621_v9 }
 0x1f4   :  { %649 = vst [vmem:[%s1099_s9 + $0x10] sm:$0xff] %v645_v11  ;;  %v643_v16 = vmax.f32 %v639_v12, 0.0  ;;  %v642_v17 = vadd.f32 %v638_v13, %v296_v10  ;;  %v636_v18 = vmax.f32 %v632_v14, 0.0 }
 0x1f6   :  { %647 = vst [vmem:[%s1099_s9] sm:$0xff] %v643_v16  ;;  %v646_v63 = vmax.f32 %v642_v17, 0.0  ;;  %v640_v19 = vadd.f32 %v636_v18, %v294_v15 }
 0x1f8   :  { %650 = vst [vmem:[%s1099_s9 + $0x18] sm:$0xff] %v646_v63  ;;  %v644_v20 = vmax.f32 %v640_v19, 0.0 }
 0x1fa   :  { %648 = vst [vmem:[%s1099_s9 + $0x8] sm:$0xff] %v644_v20 }

// kernel: tile.33
= control target key start
LH: loop header
LB: loop body
LE: loop exit
PB: predicated region body
PF: predicated region fallthrough
CT: control target
= control target key end

     0   :  { %s28_s0 = inlined_call_operand.vmem [shape: f32[8], index: 0, kind: input, shape index: {}]   ;;  %s29_s1 = inlined_call_operand.vmem [shape: f32[16,8], index: 1, kind: output, shape index: {}]  }
   0x1   :  { %v4_v0 = vld [vmem:[%s28_s0] ss:$0 sm:$0xff] }
   0x2   :  { %5 = vst [vmem:[%s29_s1] sm:$0xff] %v4_v0  ;;  %8 = vst [vmem:[%s29_s1 + $0x8] sm:$0xff] %v4_v0 }

// kernel: tile.34
= control target key start
LH: loop header
LB: loop body
LE: loop exit
PB: predicated region body
PF: predicated region fallthrough
CT: control target
= control target key end

     0   :  { %s133_s10 = smov 120   ;;  %s134_s11 = smov 104   ;;  %vm3_vm0 = vcmask 64512   ;;  %vm9_vm1 = vcmask 1048512   ;;  %vm15_vm2 = vcmask 982912   ;;  %vm21_vm3 = vcmask 917312   ;;  %s209_s0 = inlined_call_operand.vmem [shape: f32[16,8], index: 0, kind: input, shape index: {}]   ;;  %s210_s1 = inlined_call_operand.vmem [shape: f32[1,128], index: 1, kind: output, shape index: {}]  }
   0x1   :  { %v103_v0 = vld [vmem:[%s209_s0 + $0xf] sm:$0x1]   ;;  %v105_v1 = vld [vmem:[%s209_s0 + $0xd] sm:$0x1]   ;;  %v104_v2 = vld [vmem:[%s209_s0 + $0xe] sm:$0x1]  }
   0x2   :  { %7 = vrot.lane.b32.xlu0 %v103_v0, %s133_s10  ;;  %19 = vrot.lane.b32.xlu1 %v105_v1, %s134_s11  ;;  %v106_v3 = vld [vmem:[%s209_s0 + $0xc] sm:$0x1]   ;;  %s135_s16 = smov 112   ;;  %s136_s17 = smov 96   ;;  %v107_v4 = vld [vmem:[%s209_s0 + $0xb] sm:$0x1]  }
   0x3   :  { %v108_v5 = vld [vmem:[%s209_s0 + $0xa] sm:$0x1]   ;;  %v2_v6 = vld [vmem:[%s209_s0] sm:$0x1]   ;;  %s137_s24 = smov 88   ;;  %s138_s25 = smov 80  }
   0x4   :  { %4 = vst.msk [vmem:[#allocation0] sm:$0x1] %vm3_vm0, %v2_v6   ;;  %v109_v7 = vld [vmem:[%s209_s0 + $0x9] sm:$0x1]   ;;  %v110_v8 = vld [vmem:[%s209_s0 + $0x8] sm:$0x1]  }
   0x5   :  { %s139_s30 = smov 72   ;;  %s140_s2 = smov 64   ;;  %v111_v9 = vld [vmem:[%s209_s0 + $0x7] sm:$0x1]   ;;  %v112_v10 = vld [vmem:[%s209_s0 + $0x6] sm:$0x1]  }
   0x6   :  { %13 = vrot.lane.b32.xlu0 %v104_v2, %s135_s16  ;;  %25 = vrot.lane.b32.xlu1 %v106_v3, %s136_s17  ;;  %s141_s7 = smov 56   ;;  %s142_s8 = smov 48   ;;  %v113_v11 = vld [vmem:[%s209_s0 + $0x5] sm:$0x1]   ;;  %v114_v12 = vld [vmem:[%s209_s0 + $0x4] sm:$0x1]  }
   0x7   :  { %s143_s13 = smov 40   ;;  %s144_s14 = smov 32   ;;  %v115_v13 = vld [vmem:[%s209_s0 + $0x3] sm:$0x1]   ;;  %v116_v14 = vld [vmem:[%s209_s0 + $0x2] sm:$0x1]  }
   0x8   :  { %s145_s19 = smov 24   ;;  %s146_s20 = smov 16   ;;  %v117_v15 = vld [vmem:[%s209_s0 + $0x1] sm:$0x1]   ;;  %vm27_vm4 = vcmask 851712   ;;  %vm33_vm5 = vcmask 786112  }
   0x9   :  { %s147_s0 = smov 8   ;;  %vm39_vm6 = vcmask 720512   ;;  %vm45_vm7 = vcmask 654912   ;;  %vm51_vm8 = vcmask 589312   ;;  %vm57_vm9 = vcmask 523712  }
   0xa   :  { %31 = vrot.lane.b32.xlu0 %v107_v4, %s137_s24  ;;  %37 = vrot.lane.b32.xlu1 %v108_v5, %s138_s25  ;;  %vm63_vm10 = vcmask 458112   ;;  %vm69_vm11 = vcmask 392512   ;;  %vm75_vm12 = vcmask 326912   ;;  %vm81_vm13 = vcmask 261312  }
   0xb   :  { %vm87_vm14 = vcmask 195712   ;;  %vm93_vm15 = vcmask 130112  }
   0xe   :  { %43 = vrot.lane.b32.xlu0 %v109_v7, %s139_s30  ;;  %49 = vrot.lane.b32.xlu1 %v110_v8, %s140_s2 }
  0x12   :  { %55 = vrot.lane.b32.xlu0 %v111_v9, %s141_s7  ;;  %61 = vrot.lane.b32.xlu1 %v112_v10, %s142_s8 }
  0x16   :  { %67 = vrot.lane.b32.xlu0 %v113_v11, %s143_s13  ;;  %73 = vrot.lane.b32.xlu1 %v114_v12, %s144_s14 }
  0x1a   :  { %79 = vrot.lane.b32.xlu0 %v115_v13, %s145_s19  ;;  %85 = vrot.lane.b32.xlu1 %v116_v14, %s146_s20 }
  0x1e   :  { %91 = vrot.lane.b32.xlu0 %v117_v15, %s147_s0 }
  0x74   :  { %v8_v16 = vpop.permute.xlu0 %7   ;;  %v20_v17 = vpop.permute.xlu1 %19  }
  0x75   :  { %10 = vst.msk [vmem:[#allocation0] sm:$0x1] %vm9_vm1, %v8_v16  }
  0x78   :  { %v14_v18 = vpop.permute.xlu0 %13   ;;  %v26_v19 = vpop.permute.xlu1 %25  }
  0x79   :  { %16 = vst.msk [vmem:[#allocation0] sm:$0x1] %vm15_vm2, %v14_v18  }
  0x7a   :  { %22 = vst.msk [vmem:[#allocation0] sm:$0x1] %vm21_vm3, %v20_v17  }
  0x7b   :  { %28 = vst.msk [vmem:[#allocation0] sm:$0x1] %vm27_vm4, %v26_v19  }
  0x7c   :  { %v32_v20 = vpop.permute.xlu0 %31   ;;  %v38_v21 = vpop.permute.xlu1 %37  }
  0x7d   :  { %34 = vst.msk [vmem:[#allocation0] sm:$0x1] %vm33_vm5, %v32_v20  }
  0x7e   :  { %40 = vst.msk [vmem:[#allocation0] sm:$0x1] %vm39_vm6, %v38_v21  }
  0x80   :  { %v44_v22 = vpop.permute.xlu0 %43   ;;  %v50_v23 = vpop.permute.xlu1 %49  }
  0x81   :  { %46 = vst.msk [vmem:[#allocation0] sm:$0x1] %vm45_vm7, %v44_v22  }
  0x82   :  { %52 = vst.msk [vmem:[#allocation0] sm:$0x1] %vm51_vm8, %v50_v23  }
  0x84   :  { %v56_v24 = vpop.permute.xlu0 %55   ;;  %v62_v25 = vpop.permute.xlu1 %61  }
  0x85   :  { %58 = vst.msk [vmem:[#allocation0] sm:$0x1] %vm57_vm9, %v56_v24  }
  0x86   :  { %64 = vst.msk [vmem:[#allocation0] sm:$0x1] %vm63_vm10, %v62_v25  }
  0x88   :  { %v68_v26 = vpop.permute.xlu0 %67   ;;  %v74_v27 = vpop.permute.xlu1 %73  }
  0x89   :  { %70 = vst.msk [vmem:[#allocation0] sm:$0x1] %vm69_vm11, %v68_v26  }
  0x8a   :  { %76 = vst.msk [vmem:[#allocation0] sm:$0x1] %vm75_vm12, %v74_v27  }
  0x8c   :  { %v80_v28 = vpop.permute.xlu0 %79   ;;  %v86_v29 = vpop.permute.xlu1 %85  }
  0x8d   :  { %82 = vst.msk [vmem:[#allocation0] sm:$0x1] %vm81_vm13, %v80_v28  }
  0x8e   :  { %88 = vst.msk [vmem:[#allocation0] sm:$0x1] %vm87_vm14, %v86_v29  }
  0x90   :  { %v92_v30 = vpop.permute.xlu0 %91  }
  0x91   :  { %94 = vst.msk [vmem:[#allocation0] sm:$0x1] %vm93_vm15, %v92_v30  }
  0x98   :  { %v99_v31 = vld [vmem:[#allocation0] sm:$0x1] }
  0x99   :  { %102 = vst [vmem:[%s210_s1] sm:$0x1] %v99_v31 }

// kernel: residual_block_pallas.1
= control target key start
LH: loop header
LB: loop body
LE: loop exit
PB: predicated region body
PF: predicated region fallthrough
CT: control target
= control target key end

     0   :  { %vm189_vm0 = vcmask 523264   ;;  %v830_v48 = vmov 0.0   ;;  %s1090_s1 = inlined_call_operand.vmem [shape: bf16[192,256], index: 1, kind: input, shape index: {}]   ;;  %s1091_s0 = inlined_call_operand.vmem [shape: f32[32,192], index: 0, kind: input, shape index: {}]   ;;  %s1092_s4 = inlined_call_operand.vmem [shape: bf16[384,128], index: 4, kind: input, shape index: {}]   ;;  %s1093_s2 = inlined_call_operand.vmem [shape: f32[1,128], index: 2, kind: input, shape index: {}]   ;;  %s1094_s3 = inlined_call_operand.vmem [shape: f32[1,128], index: 3, kind: input, shape index: {}]   ;;  %s1095_s5 = inlined_call_operand.vmem [shape: f32[1,128], index: 5, kind: input, shape index: {}]   ;;  %s1096_s7 = inlined_call_operand.vmem [shape: f32[1,128], index: 7, kind: input, shape index: {}]   ;;  %s1097_s6 = inlined_call_operand.vmem [shape: f32[1,128], index: 6, kind: input, shape index: {}]   ;;  %s1098_s8 = inlined_call_operand.vmem [shape: f32[1,128], index: 8, kind: input, shape index: {}]   ;;  %s1099_s9 = inlined_call_operand.vmem [shape: f32[32,128], index: 9, kind: output, shape index: {}]  }
   0x1   :  { %v770_v0 = vld [vmem:[%s1090_s1 + $0x74] ss:$8 sps:$4 sm:$0xff]   ;;  %v772_v1 = vld [vmem:[%s1090_s1 + $0x70] ss:$8 sps:$4 sm:$0xff]   ;;  %v773_v2 = vld [vmem:[%s1090_s1 + $0x64] ss:$8 sps:$4 sm:$0xff]  }
   0x2   :  { %196 = vmatprep.subr.bf16.mxu0 %v770_v0  ;;  %v775_v3 = vld [vmem:[%s1090_s1 + $0x60] ss:$8 sps:$4 sm:$0xff]   ;;  %v776_v4 = vld [vmem:[%s1090_s1 + $0x54] ss:$8 sps:$4 sm:$0xff]   ;;  %v778_v5 = vld [vmem:[%s1090_s1 + $0x50] ss:$8 sps:$4 sm:$0xff]  }
   0x3   :  { %197 = vmatpush1.bf16.msra.mxu0 %v772_v1  ;;  %v779_v6 = vld [vmem:[%s1090_s1 + $0x44] ss:$8 sps:$4 sm:$0xff]   ;;  %v781_v7 = vld [vmem:[%s1090_s1 + $0x40] ss:$8 sps:$4 sm:$0xff]   ;;  %v782_v8 = vld [vmem:[%s1090_s1 + $0x34] ss:$8 sps:$4 sm:$0xff]  }
   0x4   :  { %198 = vmatprep.subr.bf16.mxu0 %v773_v2  ;;  %v784_v9 = vld [vmem:[%s1090_s1 + $0x30] ss:$8 sps:$4 sm:$0xff]   ;;  %v785_v10 = vld [vmem:[%s1090_s1 + $0x24] ss:$8 sps:$4 sm:$0xff]   ;;  %v787_v14 = vld [vmem:[%s1090_s1 + $0x20] ss:$8 sps:$4 sm:$0xff]  }
   0x5   :  { %v34_v11 = vld [vmem:[%s1091_s0 + $0x8] sm:$0xff]  ;;  %v36_v12 = vld [vmem:[%s1091_s0 + $0x18] sm:$0xff]  ;;  %v808_v19 = vld [vmem:[%s1092_s4 + $0x70] sm:$0xff]   ;;  %297 = vst [vmem:[#allocation2] sm:$0x1] %v830_v48 }
   0x6   :  { %v42_v13 = vpack.c.bf16 %v36_v12, %v34_v11  ;;  %v788_v15 = vld [vmem:[%s1090_s1 + $0x14] ss:$8 sps:$4 sm:$0xff]   ;;  %v790_v18 = vld [vmem:[%s1090_s1 + $0x10] ss:$8 sps:$4 sm:$0xff]   ;;  %v791_v20 = vld [vmem:[%s1090_s1 + $0x4] ss:$8 sps:$4 sm:$0xff]  }
   0x7   :  { %199 = vmatpush1.bf16.msra.mxu0 %v775_v3  ;;  %v806_v16 = vld [vmem:[%s1092_s4 + $0x78] sm:$0xff]   ;;  %v809_v21 = vld [vmem:[%s1092_s4 + $0x30] sm:$0xff]   ;;  %v810_v22 = vld [vmem:[%s1092_s4 + $0x68] sm:$0xff]   ;;  %298 = vst [vmem:[#allocation2 + $0x18] sm:$0x1] %v830_v48 }
   0x8   :  { %200 = vmatprep.subr.bf16.mxu0 %v776_v4  ;;  %679 = vmatprep.mubr.msk.bf16.mxu0 %vm189_vm0, %v42_v13  ;;  %v807_v17 = vld [vmem:[%s1092_s4 + $0x38] sm:$0xff]   ;;  %v811_v23 = vld [vmem:[%s1092_s4 + $0x28] sm:$0xff]   ;;  %v33_v33 = vld [vmem:[%s1091_s0] sm:$0xff]  ;;  %299 = vst [vmem:[#allocation2 + $0x11] sm:$0x1] %v830_v48 }
   0x9   :  { %711 = vmatprep.subr.bf16.mxu1 %v806_v16  ;;  %v793_v24 = vld [vmem:[%s1090_s1] ss:$8 sps:$4 sm:$0xff]   ;;  %v794_v25 = vld [vmem:[%s1090_s1 + $0xb4] ss:$8 sps:$4 sm:$0xff]   ;;  %v796_v26 = vld [vmem:[%s1090_s1 + $0xb0] ss:$8 sps:$4 sm:$0xff]  }
   0xa   :  { %712 = vmatpush3.bf16.msra.mxu1 %v807_v17  ;;  %v797_v27 = vld [vmem:[%s1090_s1 + $0xa4] ss:$8 sps:$4 sm:$0xff]   ;;  %v799_v28 = vld [vmem:[%s1090_s1 + $0xa0] ss:$8 sps:$4 sm:$0xff]   ;;  %v800_v29 = vld [vmem:[%s1090_s1 + $0x94] ss:$8 sps:$4 sm:$0xff]  }
   0xb   :  { %201 = vmatpush1.bf16.msra.mxu0 %v778_v5  ;;  %713 = vmatprep.subr.bf16.mxu1 %v808_v19  ;;  %v802_v30 = vld [vmem:[%s1090_s1 + $0x90] ss:$8 sps:$4 sm:$0xff]   ;;  %v803_v31 = vld [vmem:[%s1090_s1 + $0x84] ss:$8 sps:$4 sm:$0xff]   ;;  %v805_v32 = vld [vmem:[%s1090_s1 + $0x80] ss:$8 sps:$4 sm:$0xff]  }
   0xc   :  { %202 = vmatprep.subr.bf16.mxu0 %v779_v6  ;;  %v35_v34 = vld [vmem:[%s1091_s0 + $0x10] sm:$0xff]  ;;  %v38_v35 = vld [vmem:[%s1091_s0 + $0x28] sm:$0xff]  ;;  %v40_v36 = vld [vmem:[%s1091_s0 + $0x38] sm:$0xff]  ;;  %300 = vst [vmem:[#allocation2 + $0x29] sm:$0x1] %v830_v48 }
   0xd   :  { %v41_v37 = vpack.c.bf16 %v35_v34, %v33_v33  ;;  %v44_v38 = vpack.c.bf16 %v40_v36, %v38_v35  ;;  %v37_v39 = vld [vmem:[%s1091_s0 + $0x20] sm:$0xff]  ;;  %v39_v40 = vld [vmem:[%s1091_s0 + $0x30] sm:$0xff]  ;;  %v814_v44 = vld [vmem:[%s1092_s4 + $0x58] sm:$0xff]  }
   0xe   :  { %714 = vmatpush3.bf16.msra.mxu1 %v809_v21  ;;  %v43_v41 = vpack.c.bf16 %v39_v40, %v37_v39  ;;  %v812_v42 = vld [vmem:[%s1092_s4 + $0x60] sm:$0xff]   ;;  %v815_v45 = vld [vmem:[%s1092_s4 + $0x18] sm:$0xff]   ;;  %v816_v46 = vld [vmem:[%s1092_s4 + $0x50] sm:$0xff]  }
   0xf   :  { %203 = vmatpush1.bf16.msra.mxu0 %v781_v7  ;;  %715 = vmatprep.subr.bf16.mxu1 %v810_v22  ;;  %v813_v43 = vld [vmem:[%s1092_s4 + $0x20] sm:$0xff]   ;;  %v817_v47 = vld [vmem:[%s1092_s4 + $0x10] sm:$0xff]   ;;  %v818_v49 = vld [vmem:[%s1092_s4 + $0x48] sm:$0xff]  }
  0x10   :  { %204 = vmatprep.subr.bf16.mxu0 %v782_v8  ;;  %v819_v50 = vld [vmem:[%s1092_s4 + $0x8] sm:$0xff]   ;;  %v820_v51 = vld [vmem:[%s1092_s4 + $0x40] sm:$0xff]   ;;  %v822_v53 = vld [vmem:[%s1092_s4 + $0xb8] sm:$0xff]  }
  0x11   :  { %v821_v52 = vld [vmem:[%s1092_s4] sm:$0xff]   ;;  %v824_v17 = vld [vmem:[%s1092_s4 + $0xa8] sm:$0xff]  }
  0x12   :  { %716 = vmatpush3.bf16.msra.mxu1 %v811_v23  ;;  %v681_v54 = vld [vmem:[%s1093_s2] ss:$0 sm:$0xff] }
  0x13   :  { %205 = vmatpush1.bf16.msra.mxu0 %v784_v9  ;;  %717 = vmatprep.subr.bf16.mxu1 %v812_v42  ;;  %v682_v56 = vld [vmem:[%s1094_s3] ss:$0 sm:$0xff] }
  0x14   :  { %206 = vmatprep.subr.bf16.mxu0 %v785_v10  ;;  %v825_v23 = vld [vmem:[%s1092_s4 + $0xa0] sm:$0xff]  }
  0x15   :  { %v709_v42 = vld [vmem:[%s1095_s5] ss:$0 sm:$0xff] }
  0x16   :  { %718 = vmatpush3.bf16.msra.mxu1 %v813_v43  ;;  %v683_v43 = vld [vmem:[%s1096_s7] ss:$0 sm:$0xff] }
  0x17   :  { %207 = vmatpush1.bf16.msra.mxu0 %v787_v14  ;;  %719 = vmatprep.subr.bf16.mxu1 %v814_v44 }
  0x18   :  { %208 = vmatprep.subr.bf16.mxu0 %v788_v15  ;;  %v823_v15 = vld [vmem:[%s1092_s4 + $0xb0] sm:$0xff]  }
  0x1a   :  { %720 = vmatpush3.bf16.msra.mxu1 %v815_v45 }
  0x1b   :  { %209 = vmatpush1.bf16.msra.mxu0 %v790_v18  ;;  %721 = vmatprep.subr.bf16.mxu1 %v816_v46 }
  0x1c   :  { %210 = vmatprep.subr.bf16.mxu0 %v791_v20 }
  0x1e   :  { %722 = vmatpush3.bf16.msra.mxu1 %v817_v47  ;;  %v710_v47 = vld [vmem:[%s1097_s6] ss:$0 sm:$0xff] }
  0x1f   :  { %211 = vmatpush1.bf16.msra.mxu0 %v793_v24  ;;  %723 = vmatprep.subr.bf16.mxu1 %v818_v49 }
  0x20   :  { %220 = vmatprep.subr.bf16.mxu0 %v794_v25  ;;  %v826_v25 = vld [vmem:[%s1092_s4 + $0x98] sm:$0xff]  }
  0x22   :  { %724 = vmatpush3.bf16.msra.mxu1 %v819_v50 }
  0x23   :  { %221 = vmatpush2.bf16.msra.mxu0 %v796_v26  ;;  %725 = vmatprep.subr.bf16.mxu1 %v820_v51  ;;  %v827_v26 = vld [vmem:[%s1092_s4 + $0x90] sm:$0xff]  }
  0x24   :  { %222 = vmatprep.subr.bf16.mxu0 %v797_v27  ;;  %v828_v27 = vld [vmem:[%s1092_s4 + $0x88] sm:$0xff]  }
  0x26   :  { %726 = vmatpush3.bf16.msra.mxu1 %v821_v52 }
  0x27   :  { %223 = vmatpush2.bf16.msra.mxu0 %v799_v28  ;;  %749 = vmatprep.subr.bf16.mxu1 %v822_v53  ;;  %v829_v28 = vld [vmem:[%s1092_s4 + $0x80] sm:$0xff]  }
  0x28   :  { %224 = vmatprep.subr.bf16.mxu0 %v800_v29 }
  0x2b   :  { %225 = vmatpush2.bf16.msra.mxu0 %v802_v30 }
  0x2c   :  { %226 = vmatprep.subr.bf16.mxu0 %v803_v31 }
  0x2f   :  { %227 = vmatpush2.bf16.msra.mxu0 %v805_v32 }
  0x32   :  { %229 = vmatmul.mubr.bf16.vlgmr.msra.gmra.mxu0 %v41_v37 }
  0x33   :  { %680 = vmatprep.mubr.msk.bf16.mxu0 %vm189_vm0, %v44_v38 }
  0x3a   :  { %239 = vmatmul.mubr.bf16.gmra.mxu0 %v43_v41 }
  0xf2   :  { %v230_v55 = vpop.f32.mrf.mxu0 }
  0xf3   :  { %v256_v57 = vmul.f32 %v681_v54, %v230_v55  ;;  %v684_v55 = vld [vmem:[%s1098_s8] ss:$0 sm:$0xff] }
  0xf4   :  { %v1036_v58 = vpop.f32.mrf.mxu0 }
  0xf5   :  { %v267_v59 = vadd.f32 %v682_v56, %v256_v57 }
  0xf6   :  { %v234_v60 = vpop.f32.mrf.mxu0 }
  0xf7   :  { %v271_v61 = vmax.f32 %v267_v59, 0.0  ;;  %v257_v62 = vmul.f32 %v681_v54, %v234_v60 }
  0xf8   :  { %v1038_v63 = vpop.f32.mrf.mxu0 }
  0xf9   :  { %301 = vst [vmem:[#allocation2 + $0x1] sm:$0xff] %v271_v61  ;;  %v268_v0 = vadd.f32 %v682_v56, %v257_v62 }
  0xfa   :  { %v240_v1 = vpop.f32.mrf.mxu0 }
  0xfb   :  { %v272_v2 = vmax.f32 %v268_v0, 0.0  ;;  %v258_v3 = vmul.f32 %v681_v54, %v240_v1 }
  0xfc   :  { %v1040_v4 = vpop.f32.mrf.mxu0 }
  0xfd   :  { %302 = vst [vmem:[#allocation2 + $0x9] sm:$0xff] %v272_v2  ;;  %v269_v5 = vadd.f32 %v682_v56, %v258_v3  ;;  %v318_v6 = vpack.c.bf16 %v272_v2, %v271_v61  ;;  %v284_v46 = vmul.f32 %v683_v43, %v1040_v4 }
  0xfe   :  { %v244_v7 = vpop.f32.mrf.mxu0 }
  0xff   :  { %v273_v8 = vmax.f32 %v269_v5, 0.0  ;;  %v259_v9 = vmul.f32 %v681_v54, %v244_v7  ;;  %547 = vmatprep.mubr.bf16.mxu1 %v318_v6  ;;  %v295_v61 = vadd.f32 %v684_v55, %v284_v46  ;;  %v283_v6 = vmul.f32 %v683_v43, %v1038_v63 }
 0x100   :  { %v305_v12 = vld [vmem:[#allocation2] sm:$0xff]  ;;  %v246_v49 = vpop.f32.mrf.mxu0 }
 0x101   :  { %303 = vst [vmem:[#allocation2 + $0x19] sm:$0xff] %v273_v8  ;;  %v270_v10 = vadd.f32 %v682_v56, %v259_v9  ;;  %v285_v62 = vmul.f32 %v683_v43, %v246_v49 }
 0x103   :  { %v274_v11 = vmax.f32 %v270_v10, 0.0  ;;  %v296_v10 = vadd.f32 %v684_v55, %v285_v62 }
 0x104   :  { %v306_v13 = vld [vmem:[#allocation2 + $0x8] sm:$0xff] }
 0x105   :  { %304 = vst [vmem:[#allocation2 + $0x21] sm:$0xff] %v274_v11  ;;  %v317_v14 = vpack.c.bf16 %v306_v13, %v305_v12  ;;  %v321_v16 = vpack.c.bf16 %v274_v11, %v273_v8  ;;  %v313_v19 = vld [vmem:[#allocation2 + $0x2] sm:$0xff]  ;;  %v314_v20 = vld [vmem:[#allocation2 + $0xa] sm:$0xff] }
 0x106   :  { %v319_v24 = vpack.c.bf16 %v314_v20, %v313_v19 }
 0x107   :  { %548 = vmatmul.mubr.bf16.vlgmr.msra.gmra.mxu1 %v317_v14 }
 0x108   :  { %750 = vmatpush3.bf16.msra.mxu1 %v822_v53  ;;  %555 = vmatprep.mubr.bf16.mxu1 %v321_v16  ;;  %v307_v18 = vld [vmem:[#allocation2 + $0x18] sm:$0xff]  ;;  %v282_v53 = vmul.f32 %v683_v43, %v1036_v58 }
 0x109   :  { %751 = vmatprep.subr.bf16.mxu1 %v823_v15 }
 0x10a   :  { %v293_v5 = vadd.f32 %v684_v55, %v282_v53 }
 0x10c   :  { %752 = vmatpush3.bf16.msra.mxu1 %v823_v15  ;;  %v308_v21 = vld [vmem:[#allocation2 + $0x20] sm:$0xff]  ;;  %v294_v15 = vadd.f32 %v684_v55, %v283_v6 }
 0x10d   :  { %753 = vmatprep.subr.bf16.mxu1 %v824_v17  ;;  %v320_v22 = vpack.c.bf16 %v308_v21, %v307_v18  ;;  %v315_v29 = vld [vmem:[#allocation2 + $0x1a] sm:$0xff]  ;;  %v316_v30 = vld [vmem:[#allocation2 + $0x22] sm:$0xff] }
 0x10e   :  { %v322_v31 = vpack.c.bf16 %v316_v30, %v315_v29 }
 0x10f   :  { %556 = vmatmul.mubr.bf16.gmra.mxu1 %v320_v22 }
 0x110   :  { %754 = vmatpush3.bf16.msra.mxu1 %v824_v17  ;;  %765 = vmatprep.mubr.bf16.mxu1 %v319_v24 }
 0x111   :  { %755 = vmatprep.subr.bf16.mxu1 %v825_v23 }
 0x114   :  { %756 = vmatpush3.bf16.msra.mxu1 %v825_v23 }
 0x115   :  { %757 = vmatprep.subr.bf16.mxu1 %v826_v25 }
 0x118   :  { %758 = vmatpush3.bf16.msra.mxu1 %v826_v25 }
 0x119   :  { %759 = vmatprep.subr.bf16.mxu1 %v827_v26 }
 0x11c   :  { %760 = vmatpush3.bf16.msra.mxu1 %v827_v26 }
 0x11d   :  { %761 = vmatprep.subr.bf16.mxu1 %v828_v27 }
 0x120   :  { %762 = vmatpush3.bf16.msra.mxu1 %v828_v27 }
 0x121   :  { %763 = vmatprep.subr.bf16.mxu1 %v829_v28 }
 0x124   :  { %764 = vmatpush3.bf16.msra.mxu1 %v829_v28 }
 0x127   :  { %766 = vmatmul.mubr.bf16.vlgmr.msra.gmra.mxu1 %v322_v31 }
 0x1c7   :  { %v727_v32 = vpop.f32.mrf.mxu1 }
 0x1c9   :  { %v728_v33 = vpop.f32.mrf.mxu1 }
 0x1ca   :  { %v729_v44 = vadd.f32 %v728_v33, %v727_v32 }
 0x1cb   :  { %v730_v34 = vpop.f32.mrf.mxu1 }
 0x1cd   :  { %v731_v35 = vpop.f32.mrf.mxu1 }
 0x1ce   :  { %v732_v56 = vadd.f32 %v731_v35, %v730_v34 }
 0x1cf   :  { %v733_v36 = vpop.f32.mrf.mxu1 }
 0x1d1   :  { %v734_v37 = vpop.f32.mrf.mxu1 }
 0x1d2   :  { %v735_v40 = vadd.f32 %v734_v37, %v733_v36 }
 0x1d3   :  { %v736_v38 = vpop.f32.mrf.mxu1 }
 0x1d5   :  { %v737_v39 = vpop.f32.mrf.mxu1 }
 0x1d6   :  { %v738_v50 = vadd.f32 %v737_v39, %v736_v38 }
 0x1e7   :  { %v767_v41 = vpop.f32.mrf.mxu1 }
 0x1e8   :  { %v607_v45 = vadd.f32 %v767_v41, %v735_v40 }
 0x1e9   :  { %v598_v48 = vpop.f32.mrf.mxu1 }
 0x1ea   :  { %v622_v51 = vmul.f32 %v709_v42, %v607_v45  ;;  %v599_v52 = vadd.f32 %v729_v44, %v598_v48 }
 0x1eb   :  { %v768_v54 = vpop.f32.mrf.mxu1 }
 0x1ec   :  { %v633_v57 = vadd.f32 %v710_v47, %v622_v51  ;;  %v620_v59 = vmul.f32 %v709_v42, %v599_v52  ;;  %v610_v60 = vadd.f32 %v768_v54, %v738_v50 }
 0x1ed   :  { %v601_v0 = vpop.f32.mrf.mxu1 }
 0x1ee   :  { %v637_v1 = vmax.f32 %v633_v57, 0.0  ;;  %v631_v2 = vadd.f32 %v710_v47, %v620_v59  ;;  %v623_v3 = vmul.f32 %v709_v42, %v610_v60  ;;  %v602_v4 = vadd.f32 %v732_v56, %v601_v0 }
 0x1f0   :  { %v641_v58 = vadd.f32 %v637_v1, %v295_v61  ;;  %v635_v7 = vmax.f32 %v631_v2, 0.0  ;;  %v634_v8 = vadd.f32 %v710_v47, %v623_v3  ;;  %v621_v9 = vmul.f32 %v709_v42, %v602_v4 }
 0x1f2   :  { %v645_v11 = vmax.f32 %v641_v58, 0.0  ;;  %v639_v12 = vadd.f32 %v635_v7, %v293_v5  ;;  %v638_v13 = vmax.f32 %v634_v8, 0.0  ;;  %v632_v14 = vadd.f32 %v710_v47, %v621_v9 }
 0x1f4   :  { %649 = vst [vmem:[%s1099_s9 + $0x10] sm:$0xff] %v645_v11  ;;  %v643_v16 = vmax.f32 %v639_v12, 0.0  ;;  %v642_v17 = vadd.f32 %v638_v13, %v296_v10  ;;  %v636_v18 = vmax.f32 %v632_v14, 0.0 }
 0x1f6   :  { %647 = vst [vmem:[%s1099_s9] sm:$0xff] %v643_v16  ;;  %v646_v63 = vmax.f32 %v642_v17, 0.0  ;;  %v640_v19 = vadd.f32 %v636_v18, %v294_v15 }
 0x1f8   :  { %650 = vst [vmem:[%s1099_s9 + $0x18] sm:$0xff] %v646_v63  ;;  %v644_v20 = vmax.f32 %v640_v19, 0.0 }
 0x1fa   :  { %648 = vst [vmem:[%s1099_s9 + $0x8] sm:$0xff] %v644_v20 }

</bundles_post_ra>
